<compile_context>
chip_gen: v7x
topology: tpu7x:2x2x1
jax: 0.10.0
libtpu: 0.0.40
codegen_flags: <defaults>
</compile_context>

<pallas_src>
import jax
import jax.numpy as jnp
import numpy as np
from jax.experimental import pallas as pl
from jax.experimental.pallas import tpu as pltpu

IN_C, OUT_C, K, STRIDE, PAD = 8, 2, 3, 2, 1
H_IN = W_IN = 32
H_OUT = (H_IN - 1) * STRIDE - 2 * PAD + K        # 63
PAD_EQ = K - 1 - PAD                             # 1 (only used by the reference)

# Shift slots (plane index):
#   0 -> x[a,   b  ]    1 -> x[a,   b+1]
#   2 -> x[a+1, b  ]    3 -> x[a+1, b+1]
# Phase taps: y[o, 2a+r, 2b+s] = b3[o] + sum_i sum_(shift,kh,kw) planes[shift][a,b] * W[i,o,kh,kw]
# (derived from the transposed-conv index relation p = 2h - 1 + kh, q = 2w - 1 + kw)
PHASE_TAPS = (
    ((0, 1, 1),),                                      # phase (r=0, s=0) even/even
    ((0, 1, 2), (1, 1, 0)),                            # phase (r=0, s=1) even/odd
    ((0, 2, 1), (2, 0, 1)),                            # phase (r=1, s=0) odd/even
    ((0, 2, 2), (1, 2, 0), (2, 0, 2), (3, 0, 0)),      # phase (r=1, s=1) odd/odd
)
N_PH = len(PHASE_TAPS)


def convt_kernel(w_ref, b3_ref, x_ref, o_ref):
    # w_ref : SMEM (IN_C*OUT_C*K*K,)   torch-layout weight flattened as [i, o, kh, kw]
    # b3_ref: SMEM (OUT_C,)            bias + 3.0
    # x_ref : VMEM (IN_C, 8, 128)      raw 32x32 planes, row-major flattened (lane dense)
    # o_ref : VMEM (OUT_C, 4, 8, 128)  per-phase outputs, lane dense (unmasked stores)
    lane = jax.lax.broadcasted_iota(jnp.int32, (8, 128), 1)
    hi_lane = lane >= 96                  # positions whose row-shift data lives in the next sublane

    b3 = [b3_ref[o] for o in range(OUT_C)]                    # hoisted scalar reads
    accs = [[None] * N_PH for _ in range(OUT_C)]

    for i in range(IN_C):
        # Synthesize the 4 shifted planes once per input channel (XLU rolls).
        # Positive shifts are the length-complement of the desired -1 / -32 / -1.
        p00 = x_ref[i, :, :]                                  # x[a,   b  ]
        p01 = pltpu.roll(p00, 127, axis=1)                    # x[a,   b+1]  (flat +1)
        lane32 = pltpu.roll(p00, 96, axis=1)                  # within-row flat +32
        sub1 = pltpu.roll(lane32, 7, axis=0)                  # next-sublane variant
        p10 = jnp.where(hi_lane, sub1, lane32)                # x[a+1, b  ]  (flat +32)
        p11 = pltpu.roll(p10, 127, axis=1)                    # x[a+1, b+1]  (flat +33)
        # Wrapped values only land at input row/col 31 -> output row/col 63 -> cropped.
        planes = (p00, p01, p10, p11)

        for o in range(OUT_C):                                # reuse planes for both out-chans
            for ph, taps in enumerate(PHASE_TAPS):
                acc = accs[o][ph]
                for (s, kh, kw) in taps:
                    w = w_ref[((i * OUT_C + o) * K + kh) * K + kw]
                    term = planes[s] * w
                    if acc is None:
                        acc = term + b3[o]                    # fold bias+3 into first tap
                    else:
                        acc = acc + term
                accs[o][ph] = acc

    for o in range(OUT_C):
        for ph in range(N_PH):
            o_ref[o, ph, :, :] = accs[o][ph]


@jax.jit
def conv_transpose_plus3(x_nchw, weight, bias):
    """x_nchw: (1, IN_C, 32, 32); weight: (IN_C, OUT_C, K, K) torch layout."""
    x = x_nchw[0].astype(jnp.float32).reshape(IN_C, 8, 128)   # lane-dense planes (free reshape)
    w_flat = weight.astype(jnp.float32).reshape(-1)           # flattened [i, o, kh, kw]
    b3 = (bias + 3.0).astype(jnp.float32)                     # fold the "+3" into bias

    out = pl.pallas_call(
        convt_kernel,
        out_shape=jax.ShapeDtypeStruct((OUT_C, N_PH, 8, 128), jnp.float32),
        in_specs=[
            pl.BlockSpec(memory_space=pltpu.MemorySpace.SMEM),
            pl.BlockSpec(memory_space=pltpu.MemorySpace.SMEM),
            pl.BlockSpec(memory_space=pltpu.MemorySpace.VMEM),
        ],
        out_specs=pl.BlockSpec(memory_space=pltpu.MemorySpace.VMEM),
    )(w_flat, b3, x)

    # Phase interleave back to 63x63 (fused inside this jit with the crop).
    phases = out.reshape(OUT_C, 2, 2, H_IN, W_IN)             # [o, r, s, a, b]
    y = phases.transpose(0, 3, 1, 4, 2).reshape(OUT_C, 2 * H_IN, 2 * W_IN)
    return y[None, :, :H_OUT, :H_OUT]                         # (1, OUT_C, 63, 63)


def reference(x_nchw, weight, bias):
    # independent check via lax conv with lhs_dilation (== conv transpose)
    w_conv = jnp.flip(jnp.transpose(weight, (1, 0, 2, 3)), axis=(2, 3))
    y = jax.lax.conv_general_dilated(
        x_nchw, w_conv,
        window_strides=(1, 1),
        padding=[(PAD_EQ, PAD_EQ), (PAD_EQ, PAD_EQ)],
        lhs_dilation=(STRIDE, STRIDE),
        rhs_dilation=(1, 1),
        dimension_numbers=("NCHW", "OIHW", "NCHW"),
    )
    return y + bias[None, :, None, None] + 3.0


if __name__ == "__main__":
    key = jax.random.PRNGKey(0)
    kx, kw, kb = jax.random.split(key, 3)

    # the module's fixed input: torch.randn(1, 8, 32, 32)
    x1 = jax.random.normal(kx, (1, IN_C, H_IN, W_IN), dtype=jnp.float32)

    # deterministic parameter init (same shapes as torch ConvTranspose2d(8,2,3))
    fan_in = IN_C * K * K
    bound = 1.0 / np.sqrt(fan_in)
    weight = jax.random.uniform(kw, (IN_C, OUT_C, K, K), jnp.float32, -bound, bound)
    bias = jax.random.uniform(kb, (OUT_C,), jnp.float32, -bound, bound)

    y = conv_transpose_plus3(x1, weight, bias)
    y = jax.block_until_ready(y)

    y_ref = reference(x1, weight, bias)
    assert y.shape == (1, OUT_C, H_OUT, H_OUT), y.shape
    assert jnp.allclose(y, y_ref, atol=1e-4, rtol=1e-4), float(jnp.max(jnp.abs(y - y_ref)))

    print("KERNEL_OK")
</pallas_src>

<mosaic_0001>
module attributes {stable_mosaic.version = 11 : i64} {
  func.func @convt_kernel(%arg0: memref<144xf32, #tpu.memory_space<smem>>, %arg1: memref<2xf32, #tpu.memory_space<smem>>, %arg2: memref<8x8x128xf32, #tpu.memory_space<vmem>>, %arg3: memref<2x4x8x128xf32, #tpu.memory_space<vmem>>) attributes {dimension_semantics = [], scalar_prefetch = 0 : i64, scratch_operands = 0 : i64, tpu.core_type = #tpu.core_type<tc>} {
    %0 = tpu.iota {dimensions = array<i32: 1>} : vector<8x128xi32>
    %c96_i32 = arith.constant 96 : i32
    %1 = vector.broadcast %c96_i32 : i32 to vector<8x128xi32>
    %2 = arith.cmpi sge, %0, %1 : vector<8x128xi32>
    %c0 = arith.constant 0 : index
    %3 = memref.load %arg1[%c0] : memref<2xf32, #tpu.memory_space<smem>>
    %c1 = arith.constant 1 : index
    %4 = memref.load %arg1[%c1] : memref<2xf32, #tpu.memory_space<smem>>
    %c0_0 = arith.constant 0 : index
    %c0_1 = arith.constant 0 : index
    %c0_2 = arith.constant 0 : index
    %5 = vector.load %arg2[%c0_0, %c0_1, %c0_2] : memref<8x8x128xf32, #tpu.memory_space<vmem>>, vector<1x8x128xf32>
    %6 = vector.shape_cast %5 : vector<1x8x128xf32> to vector<8x128xf32>
    %c127_i32 = arith.constant 127 : i32
    %7 = tpu.dynamic_rotate %6 by %c127_i32 dim 1 : vector<8x128xf32>, i32 -> vector<8x128xf32>
    %c96_i32_3 = arith.constant 96 : i32
    %8 = tpu.dynamic_rotate %6 by %c96_i32_3 dim 1 : vector<8x128xf32>, i32 -> vector<8x128xf32>
    %c7_i32 = arith.constant 7 : i32
    %9 = tpu.dynamic_rotate %8 by %c7_i32 dim 0 : vector<8x128xf32>, i32 -> vector<8x128xf32>
    %10 = arith.select %2, %9, %8 : vector<8x128xi1>, vector<8x128xf32>
    %c127_i32_4 = arith.constant 127 : i32
    %11 = tpu.dynamic_rotate %10 by %c127_i32_4 dim 1 : vector<8x128xf32>, i32 -> vector<8x128xf32>
    %c4 = arith.constant 4 : index
    %12 = memref.load %arg0[%c4] : memref<144xf32, #tpu.memory_space<smem>>
    %13 = vector.broadcast %12 : f32 to vector<8x128xf32>
    %14 = arith.mulf %6, %13 : vector<8x128xf32>
    %15 = vector.broadcast %3 : f32 to vector<8x128xf32>
    %16 = arith.addf %14, %15 : vector<8x128xf32>
    %c5 = arith.constant 5 : index
    %17 = memref.load %arg0[%c5] : memref<144xf32, #tpu.memory_space<smem>>
    %18 = vector.broadcast %17 : f32 to vector<8x128xf32>
    %19 = arith.mulf %6, %18 : vector<8x128xf32>
    %20 = vector.broadcast %3 : f32 to vector<8x128xf32>
    %21 = arith.addf %19, %20 : vector<8x128xf32>
    %c3 = arith.constant 3 : index
    %22 = memref.load %arg0[%c3] : memref<144xf32, #tpu.memory_space<smem>>
    %23 = vector.broadcast %22 : f32 to vector<8x128xf32>
    %24 = arith.mulf %7, %23 : vector<8x128xf32>
    %25 = arith.addf %21, %24 : vector<8x128xf32>
    %c7 = arith.constant 7 : index
    %26 = memref.load %arg0[%c7] : memref<144xf32, #tpu.memory_space<smem>>
    %27 = vector.broadcast %26 : f32 to vector<8x128xf32>
    %28 = arith.mulf %6, %27 : vector<8x128xf32>
    %29 = vector.broadcast %3 : f32 to vector<8x128xf32>
    %30 = arith.addf %28, %29 : vector<8x128xf32>
    %c1_5 = arith.constant 1 : index
    %31 = memref.load %arg0[%c1_5] : memref<144xf32, #tpu.memory_space<smem>>
    %32 = vector.broadcast %31 : f32 to vector<8x128xf32>
    %33 = arith.mulf %10, %32 : vector<8x128xf32>
    %34 = arith.addf %30, %33 : vector<8x128xf32>
    %c8 = arith.constant 8 : index
    %35 = memref.load %arg0[%c8] : memref<144xf32, #tpu.memory_space<smem>>
    %36 = vector.broadcast %35 : f32 to vector<8x128xf32>
    %37 = arith.mulf %6, %36 : vector<8x128xf32>
    %38 = vector.broadcast %3 : f32 to vector<8x128xf32>
    %39 = arith.addf %37, %38 : vector<8x128xf32>
    %c6 = arith.constant 6 : index
    %40 = memref.load %arg0[%c6] : memref<144xf32, #tpu.memory_space<smem>>
    %41 = vector.broadcast %40 : f32 to vector<8x128xf32>
    %42 = arith.mulf %7, %41 : vector<8x128xf32>
    %43 = arith.addf %39, %42 : vector<8x128xf32>
    %c2 = arith.constant 2 : index
    %44 = memref.load %arg0[%c2] : memref<144xf32, #tpu.memory_space<smem>>
    %45 = vector.broadcast %44 : f32 to vector<8x128xf32>
    %46 = arith.mulf %10, %45 : vector<8x128xf32>
    %47 = arith.addf %43, %46 : vector<8x128xf32>
    %c0_6 = arith.constant 0 : index
    %48 = memref.load %arg0[%c0_6] : memref<144xf32, #tpu.memory_space<smem>>
    %49 = vector.broadcast %48 : f32 to vector<8x128xf32>
    %50 = arith.mulf %11, %49 : vector<8x128xf32>
    %51 = arith.addf %47, %50 : vector<8x128xf32>
    %c13 = arith.constant 13 : index
    %52 = memref.load %arg0[%c13] : memref<144xf32, #tpu.memory_space<smem>>
    %53 = vector.broadcast %52 : f32 to vector<8x128xf32>
    %54 = arith.mulf %6, %53 : vector<8x128xf32>
    %55 = vector.broadcast %4 : f32 to vector<8x128xf32>
    %56 = arith.addf %54, %55 : vector<8x128xf32>
    %c14 = arith.constant 14 : index
    %57 = memref.load %arg0[%c14] : memref<144xf32, #tpu.memory_space<smem>>
    %58 = vector.broadcast %57 : f32 to vector<8x128xf32>
    %59 = arith.mulf %6, %58 : vector<8x128xf32>
    %60 = vector.broadcast %4 : f32 to vector<8x128xf32>
    %61 = arith.addf %59, %60 : vector<8x128xf32>
    %c12 = arith.constant 12 : index
    %62 = memref.load %arg0[%c12] : memref<144xf32, #tpu.memory_space<smem>>
    %63 = vector.broadcast %62 : f32 to vector<8x128xf32>
    %64 = arith.mulf %7, %63 : vector<8x128xf32>
    %65 = arith.addf %61, %64 : vector<8x128xf32>
    %c16 = arith.constant 16 : index
    %66 = memref.load %arg0[%c16] : memref<144xf32, #tpu.memory_space<smem>>
    %67 = vector.broadcast %66 : f32 to vector<8x128xf32>
    %68 = arith.mulf %6, %67 : vector<8x128xf32>
    %69 = vector.broadcast %4 : f32 to vector<8x128xf32>
    %70 = arith.addf %68, %69 : vector<8x128xf32>
    %c10 = arith.constant 10 : index
    %71 = memref.load %arg0[%c10] : memref<144xf32, #tpu.memory_space<smem>>
    %72 = vector.broadcast %71 : f32 to vector<8x128xf32>
    %73 = arith.mulf %10, %72 : vector<8x128xf32>
    %74 = arith.addf %70, %73 : vector<8x128xf32>
    %c17 = arith.constant 17 : index
    %75 = memref.load %arg0[%c17] : memref<144xf32, #tpu.memory_space<smem>>
    %76 = vector.broadcast %75 : f32 to vector<8x128xf32>
    %77 = arith.mulf %6, %76 : vector<8x128xf32>
    %78 = vector.broadcast %4 : f32 to vector<8x128xf32>
    %79 = arith.addf %77, %78 : vector<8x128xf32>
    %c15 = arith.constant 15 : index
    %80 = memref.load %arg0[%c15] : memref<144xf32, #tpu.memory_space<smem>>
    %81 = vector.broadcast %80 : f32 to vector<8x128xf32>
    %82 = arith.mulf %7, %81 : vector<8x128xf32>
    %83 = arith.addf %79, %82 : vector<8x128xf32>
    %c11 = arith.constant 11 : index
    %84 = memref.load %arg0[%c11] : memref<144xf32, #tpu.memory_space<smem>>
    %85 = vector.broadcast %84 : f32 to vector<8x128xf32>
    %86 = arith.mulf %10, %85 : vector<8x128xf32>
    %87 = arith.addf %83, %86 : vector<8x128xf32>
    %c9 = arith.constant 9 : index
    %88 = memref.load %arg0[%c9] : memref<144xf32, #tpu.memory_space<smem>>
    %89 = vector.broadcast %88 : f32 to vector<8x128xf32>
    %90 = arith.mulf %11, %89 : vector<8x128xf32>
    %91 = arith.addf %87, %90 : vector<8x128xf32>
    %c1_7 = arith.constant 1 : index
    %c0_8 = arith.constant 0 : index
    %c0_9 = arith.constant 0 : index
    %92 = vector.load %arg2[%c1_7, %c0_8, %c0_9] : memref<8x8x128xf32, #tpu.memory_space<vmem>>, vector<1x8x128xf32>
    %93 = vector.shape_cast %92 : vector<1x8x128xf32> to vector<8x128xf32>
    %c127_i32_10 = arith.constant 127 : i32
    %94 = tpu.dynamic_rotate %93 by %c127_i32_10 dim 1 : vector<8x128xf32>, i32 -> vector<8x128xf32>
    %c96_i32_11 = arith.constant 96 : i32
    %95 = tpu.dynamic_rotate %93 by %c96_i32_11 dim 1 : vector<8x128xf32>, i32 -> vector<8x128xf32>
    %c7_i32_12 = arith.constant 7 : i32
    %96 = tpu.dynamic_rotate %95 by %c7_i32_12 dim 0 : vector<8x128xf32>, i32 -> vector<8x128xf32>
    %97 = arith.select %2, %96, %95 : vector<8x128xi1>, vector<8x128xf32>
    %c127_i32_13 = arith.constant 127 : i32
    %98 = tpu.dynamic_rotate %97 by %c127_i32_13 dim 1 : vector<8x128xf32>, i32 -> vector<8x128xf32>
    %c22 = arith.constant 22 : index
    %99 = memref.load %arg0[%c22] : memref<144xf32, #tpu.memory_space<smem>>
    %100 = vector.broadcast %99 : f32 to vector<8x128xf32>
    %101 = arith.mulf %93, %100 : vector<8x128xf32>
    %102 = arith.addf %16, %101 : vector<8x128xf32>
    %c23 = arith.constant 23 : index
    %103 = memref.load %arg0[%c23] : memref<144xf32, #tpu.memory_space<smem>>
    %104 = vector.broadcast %103 : f32 to vector<8x128xf32>
    %105 = arith.mulf %93, %104 : vector<8x128xf32>
    %106 = arith.addf %25, %105 : vector<8x128xf32>
    %c21 = arith.constant 21 : index
    %107 = memref.load %arg0[%c21] : memref<144xf32, #tpu.memory_space<smem>>
    %108 = vector.broadcast %107 : f32 to vector<8x128xf32>
    %109 = arith.mulf %94, %108 : vector<8x128xf32>
    %110 = arith.addf %106, %109 : vector<8x128xf32>
    %c25 = arith.constant 25 : index
    %111 = memref.load %arg0[%c25] : memref<144xf32, #tpu.memory_space<smem>>
    %112 = vector.broadcast %111 : f32 to vector<8x128xf32>
    %113 = arith.mulf %93, %112 : vector<8x128xf32>
    %114 = arith.addf %34, %113 : vector<8x128xf32>
    %c19 = arith.constant 19 : index
    %115 = memref.load %arg0[%c19] : memref<144xf32, #tpu.memory_space<smem>>
    %116 = vector.broadcast %115 : f32 to vector<8x128xf32>
    %117 = arith.mulf %97, %116 : vector<8x128xf32>
    %118 = arith.addf %114, %117 : vector<8x128xf32>
    %c26 = arith.constant 26 : index
    %119 = memref.load %arg0[%c26] : memref<144xf32, #tpu.memory_space<smem>>
    %120 = vector.broadcast %119 : f32 to vector<8x128xf32>
    %121 = arith.mulf %93, %120 : vector<8x128xf32>
    %122 = arith.addf %51, %121 : vector<8x128xf32>
    %c24 = arith.constant 24 : index
    %123 = memref.load %arg0[%c24] : memref<144xf32, #tpu.memory_space<smem>>
    %124 = vector.broadcast %123 : f32 to vector<8x128xf32>
    %125 = arith.mulf %94, %124 : vector<8x128xf32>
    %126 = arith.addf %122, %125 : vector<8x128xf32>
    %c20 = arith.constant 20 : index
    %127 = memref.load %arg0[%c20] : memref<144xf32, #tpu.memory_space<smem>>
    %128 = vector.broadcast %127 : f32 to vector<8x128xf32>
    %129 = arith.mulf %97, %128 : vector<8x128xf32>
    %130 = arith.addf %126, %129 : vector<8x128xf32>
    %c18 = arith.constant 18 : index
    %131 = memref.load %arg0[%c18] : memref<144xf32, #tpu.memory_space<smem>>
    %132 = vector.broadcast %131 : f32 to vector<8x128xf32>
    %133 = arith.mulf %98, %132 : vector<8x128xf32>
    %134 = arith.addf %130, %133 : vector<8x128xf32>
    %c31 = arith.constant 31 : index
    %135 = memref.load %arg0[%c31] : memref<144xf32, #tpu.memory_space<smem>>
    %136 = vector.broadcast %135 : f32 to vector<8x128xf32>
    %137 = arith.mulf %93, %136 : vector<8x128xf32>
    %138 = arith.addf %56, %137 : vector<8x128xf32>
    %c32 = arith.constant 32 : index
    %139 = memref.load %arg0[%c32] : memref<144xf32, #tpu.memory_space<smem>>
    %140 = vector.broadcast %139 : f32 to vector<8x128xf32>
    %141 = arith.mulf %93, %140 : vector<8x128xf32>
    %142 = arith.addf %65, %141 : vector<8x128xf32>
    %c30 = arith.constant 30 : index
    %143 = memref.load %arg0[%c30] : memref<144xf32, #tpu.memory_space<smem>>
    %144 = vector.broadcast %143 : f32 to vector<8x128xf32>
    %145 = arith.mulf %94, %144 : vector<8x128xf32>
    %146 = arith.addf %142, %145 : vector<8x128xf32>
    %c34 = arith.constant 34 : index
    %147 = memref.load %arg0[%c34] : memref<144xf32, #tpu.memory_space<smem>>
    %148 = vector.broadcast %147 : f32 to vector<8x128xf32>
    %149 = arith.mulf %93, %148 : vector<8x128xf32>
    %150 = arith.addf %74, %149 : vector<8x128xf32>
    %c28 = arith.constant 28 : index
    %151 = memref.load %arg0[%c28] : memref<144xf32, #tpu.memory_space<smem>>
    %152 = vector.broadcast %151 : f32 to vector<8x128xf32>
    %153 = arith.mulf %97, %152 : vector<8x128xf32>
    %154 = arith.addf %150, %153 : vector<8x128xf32>
    %c35 = arith.constant 35 : index
    %155 = memref.load %arg0[%c35] : memref<144xf32, #tpu.memory_space<smem>>
    %156 = vector.broadcast %155 : f32 to vector<8x128xf32>
    %157 = arith.mulf %93, %156 : vector<8x128xf32>
    %158 = arith.addf %91, %157 : vector<8x128xf32>
    %c33 = arith.constant 33 : index
    %159 = memref.load %arg0[%c33] : memref<144xf32, #tpu.memory_space<smem>>
    %160 = vector.broadcast %159 : f32 to vector<8x128xf32>
    %161 = arith.mulf %94, %160 : vector<8x128xf32>
    %162 = arith.addf %158, %161 : vector<8x128xf32>
    %c29 = arith.constant 29 : index
    %163 = memref.load %arg0[%c29] : memref<144xf32, #tpu.memory_space<smem>>
    %164 = vector.broadcast %163 : f32 to vector<8x128xf32>
    %165 = arith.mulf %97, %164 : vector<8x128xf32>
    %166 = arith.addf %162, %165 : vector<8x128xf32>
    %c27 = arith.constant 27 : index
    %167 = memref.load %arg0[%c27] : memref<144xf32, #tpu.memory_space<smem>>
    %168 = vector.broadcast %167 : f32 to vector<8x128xf32>
    %169 = arith.mulf %98, %168 : vector<8x128xf32>
    %170 = arith.addf %166, %169 : vector<8x128xf32>
    %c2_14 = arith.constant 2 : index
    %c0_15 = arith.constant 0 : index
    %c0_16 = arith.constant 0 : index
    %171 = vector.load %arg2[%c2_14, %c0_15, %c0_16] : memref<8x8x128xf32, #tpu.memory_space<vmem>>, vector<1x8x128xf32>
    %172 = vector.shape_cast %171 : vector<1x8x128xf32> to vector<8x128xf32>
    %c127_i32_17 = arith.constant 127 : i32
    %173 = tpu.dynamic_rotate %172 by %c127_i32_17 dim 1 : vector<8x128xf32>, i32 -> vector<8x128xf32>
    %c96_i32_18 = arith.constant 96 : i32
    %174 = tpu.dynamic_rotate %172 by %c96_i32_18 dim 1 : vector<8x128xf32>, i32 -> vector<8x128xf32>
    %c7_i32_19 = arith.constant 7 : i32
    %175 = tpu.dynamic_rotate %174 by %c7_i32_19 dim 0 : vector<8x128xf32>, i32 -> vector<8x128xf32>
    %176 = arith.select %2, %175, %174 : vector<8x128xi1>, vector<8x128xf32>
    %c127_i32_20 = arith.constant 127 : i32
    %177 = tpu.dynamic_rotate %176 by %c127_i32_20 dim 1 : vector<8x128xf32>, i32 -> vector<8x128xf32>
    %c40 = arith.constant 40 : index
    %178 = memref.load %arg0[%c40] : memref<144xf32, #tpu.memory_space<smem>>
    %179 = vector.broadcast %178 : f32 to vector<8x128xf32>
    %180 = arith.mulf %172, %179 : vector<8x128xf32>
    %181 = arith.addf %102, %180 : vector<8x128xf32>
    %c41 = arith.constant 41 : index
    %182 = memref.load %arg0[%c41] : memref<144xf32, #tpu.memory_space<smem>>
    %183 = vector.broadcast %182 : f32 to vector<8x128xf32>
    %184 = arith.mulf %172, %183 : vector<8x128xf32>
    %185 = arith.addf %110, %184 : vector<8x128xf32>
    %c39 = arith.constant 39 : index
    %186 = memref.load %arg0[%c39] : memref<144xf32, #tpu.memory_space<smem>>
    %187 = vector.broadcast %186 : f32 to vector<8x128xf32>
    %188 = arith.mulf %173, %187 : vector<8x128xf32>
    %189 = arith.addf %185, %188 : vector<8x128xf32>
    %c43 = arith.constant 43 : index
    %190 = memref.load %arg0[%c43] : memref<144xf32, #tpu.memory_space<smem>>
    %191 = vector.broadcast %190 : f32 to vector<8x128xf32>
    %192 = arith.mulf %172, %191 : vector<8x128xf32>
    %193 = arith.addf %118, %192 : vector<8x128xf32>
    %c37 = arith.constant 37 : index
    %194 = memref.load %arg0[%c37] : memref<144xf32, #tpu.memory_space<smem>>
    %195 = vector.broadcast %194 : f32 to vector<8x128xf32>
    %196 = arith.mulf %176, %195 : vector<8x128xf32>
    %197 = arith.addf %193, %196 : vector<8x128xf32>
    %c44 = arith.constant 44 : index
    %198 = memref.load %arg0[%c44] : memref<144xf32, #tpu.memory_space<smem>>
    %199 = vector.broadcast %198 : f32 to vector<8x128xf32>
    %200 = arith.mulf %172, %199 : vector<8x128xf32>
    %201 = arith.addf %134, %200 : vector<8x128xf32>
    %c42 = arith.constant 42 : index
    %202 = memref.load %arg0[%c42] : memref<144xf32, #tpu.memory_space<smem>>
    %203 = vector.broadcast %202 : f32 to vector<8x128xf32>
    %204 = arith.mulf %173, %203 : vector<8x128xf32>
    %205 = arith.addf %201, %204 : vector<8x128xf32>
    %c38 = arith.constant 38 : index
    %206 = memref.load %arg0[%c38] : memref<144xf32, #tpu.memory_space<smem>>
    %207 = vector.broadcast %206 : f32 to vector<8x128xf32>
    %208 = arith.mulf %176, %207 : vector<8x128xf32>
    %209 = arith.addf %205, %208 : vector<8x128xf32>
    %c36 = arith.constant 36 : index
    %210 = memref.load %arg0[%c36] : memref<144xf32, #tpu.memory_space<smem>>
    %211 = vector.broadcast %210 : f32 to vector<8x128xf32>
    %212 = arith.mulf %177, %211 : vector<8x128xf32>
    %213 = arith.addf %209, %212 : vector<8x128xf32>
    %c49 = arith.constant 49 : index
    %214 = memref.load %arg0[%c49] : memref<144xf32, #tpu.memory_space<smem>>
    %215 = vector.broadcast %214 : f32 to vector<8x128xf32>
    %216 = arith.mulf %172, %215 : vector<8x128xf32>
    %217 = arith.addf %138, %216 : vector<8x128xf32>
    %c50 = arith.constant 50 : index
    %218 = memref.load %arg0[%c50] : memref<144xf32, #tpu.memory_space<smem>>
    %219 = vector.broadcast %218 : f32 to vector<8x128xf32>
    %220 = arith.mulf %172, %219 : vector<8x128xf32>
    %221 = arith.addf %146, %220 : vector<8x128xf32>
    %c48 = arith.constant 48 : index
    %222 = memref.load %arg0[%c48] : memref<144xf32, #tpu.memory_space<smem>>
    %223 = vector.broadcast %222 : f32 to vector<8x128xf32>
    %224 = arith.mulf %173, %223 : vector<8x128xf32>
    %225 = arith.addf %221, %224 : vector<8x128xf32>
    %c52 = arith.constant 52 : index
    %226 = memref.load %arg0[%c52] : memref<144xf32, #tpu.memory_space<smem>>
    %227 = vector.broadcast %226 : f32 to vector<8x128xf32>
    %228 = arith.mulf %172, %227 : vector<8x128xf32>
    %229 = arith.addf %154, %228 : vector<8x128xf32>
    %c46 = arith.constant 46 : index
    %230 = memref.load %arg0[%c46] : memref<144xf32, #tpu.memory_space<smem>>
    %231 = vector.broadcast %230 : f32 to vector<8x128xf32>
    %232 = arith.mulf %176, %231 : vector<8x128xf32>
    %233 = arith.addf %229, %232 : vector<8x128xf32>
    %c53 = arith.constant 53 : index
    %234 = memref.load %arg0[%c53] : memref<144xf32, #tpu.memory_space<smem>>
    %235 = vector.broadcast %234 : f32 to vector<8x128xf32>
    %236 = arith.mulf %172, %235 : vector<8x128xf32>
    %237 = arith.addf %170, %236 : vector<8x128xf32>
    %c51 = arith.constant 51 : index
    %238 = memref.load %arg0[%c51] : memref<144xf32, #tpu.memory_space<smem>>
    %239 = vector.broadcast %238 : f32 to vector<8x128xf32>
    %240 = arith.mulf %173, %239 : vector<8x128xf32>
    %241 = arith.addf %237, %240 : vector<8x128xf32>
    %c47 = arith.constant 47 : index
    %242 = memref.load %arg0[%c47] : memref<144xf32, #tpu.memory_space<smem>>
    %243 = vector.broadcast %242 : f32 to vector<8x128xf32>
    %244 = arith.mulf %176, %243 : vector<8x128xf32>
    %245 = arith.addf %241, %244 : vector<8x128xf32>
    %c45 = arith.constant 45 : index
    %246 = memref.load %arg0[%c45] : memref<144xf32, #tpu.memory_space<smem>>
    %247 = vector.broadcast %246 : f32 to vector<8x128xf32>
    %248 = arith.mulf %177, %247 : vector<8x128xf32>
    %249 = arith.addf %245, %248 : vector<8x128xf32>
    %c3_21 = arith.constant 3 : index
    %c0_22 = arith.constant 0 : index
    %c0_23 = arith.constant 0 : index
    %250 = vector.load %arg2[%c3_21, %c0_22, %c0_23] : memref<8x8x128xf32, #tpu.memory_space<vmem>>, vector<1x8x128xf32>
    %251 = vector.shape_cast %250 : vector<1x8x128xf32> to vector<8x128xf32>
    %c127_i32_24 = arith.constant 127 : i32
    %252 = tpu.dynamic_rotate %251 by %c127_i32_24 dim 1 : vector<8x128xf32>, i32 -> vector<8x128xf32>
    %c96_i32_25 = arith.constant 96 : i32
    %253 = tpu.dynamic_rotate %251 by %c96_i32_25 dim 1 : vector<8x128xf32>, i32 -> vector<8x128xf32>
    %c7_i32_26 = arith.constant 7 : i32
    %254 = tpu.dynamic_rotate %253 by %c7_i32_26 dim 0 : vector<8x128xf32>, i32 -> vector<8x128xf32>
    %255 = arith.select %2, %254, %253 : vector<8x128xi1>, vector<8x128xf32>
    %c127_i32_27 = arith.constant 127 : i32
    %256 = tpu.dynamic_rotate %255 by %c127_i32_27 dim 1 : vector<8x128xf32>, i32 -> vector<8x128xf32>
    %c58 = arith.constant 58 : index
    %257 = memref.load %arg0[%c58] : memref<144xf32, #tpu.memory_space<smem>>
    %258 = vector.broadcast %257 : f32 to vector<8x128xf32>
    %259 = arith.mulf %251, %258 : vector<8x128xf32>
    %260 = arith.addf %181, %259 : vector<8x128xf32>
    %c59 = arith.constant 59 : index
    %261 = memref.load %arg0[%c59] : memref<144xf32, #tpu.memory_space<smem>>
    %262 = vector.broadcast %261 : f32 to vector<8x128xf32>
    %263 = arith.mulf %251, %262 : vector<8x128xf32>
    %264 = arith.addf %189, %263 : vector<8x128xf32>
    %c57 = arith.constant 57 : index
    %265 = memref.load %arg0[%c57] : memref<144xf32, #tpu.memory_space<smem>>
    %266 = vector.broadcast %265 : f32 to vector<8x128xf32>
    %267 = arith.mulf %252, %266 : vector<8x128xf32>
    %268 = arith.addf %264, %267 : vector<8x128xf32>
    %c61 = arith.constant 61 : index
    %269 = memref.load %arg0[%c61] : memref<144xf32, #tpu.memory_space<smem>>
    %270 = vector.broadcast %269 : f32 to vector<8x128xf32>
    %271 = arith.mulf %251, %270 : vector<8x128xf32>
    %272 = arith.addf %197, %271 : vector<8x128xf32>
    %c55 = arith.constant 55 : index
    %273 = memref.load %arg0[%c55] : memref<144xf32, #tpu.memory_space<smem>>
    %274 = vector.broadcast %273 : f32 to vector<8x128xf32>
    %275 = arith.mulf %255, %274 : vector<8x128xf32>
    %276 = arith.addf %272, %275 : vector<8x128xf32>
    %c62 = arith.constant 62 : index
    %277 = memref.load %arg0[%c62] : memref<144xf32, #tpu.memory_space<smem>>
    %278 = vector.broadcast %277 : f32 to vector<8x128xf32>
    %279 = arith.mulf %251, %278 : vector<8x128xf32>
    %280 = arith.addf %213, %279 : vector<8x128xf32>
    %c60 = arith.constant 60 : index
    %281 = memref.load %arg0[%c60] : memref<144xf32, #tpu.memory_space<smem>>
    %282 = vector.broadcast %281 : f32 to vector<8x128xf32>
    %283 = arith.mulf %252, %282 : vector<8x128xf32>
    %284 = arith.addf %280, %283 : vector<8x128xf32>
    %c56 = arith.constant 56 : index
    %285 = memref.load %arg0[%c56] : memref<144xf32, #tpu.memory_space<smem>>
    %286 = vector.broadcast %285 : f32 to vector<8x128xf32>
    %287 = arith.mulf %255, %286 : vector<8x128xf32>
    %288 = arith.addf %284, %287 : vector<8x128xf32>
    %c54 = arith.constant 54 : index
    %289 = memref.load %arg0[%c54] : memref<144xf32, #tpu.memory_space<smem>>
    %290 = vector.broadcast %289 : f32 to vector<8x128xf32>
    %291 = arith.mulf %256, %290 : vector<8x128xf32>
    %292 = arith.addf %288, %291 : vector<8x128xf32>
    %c67 = arith.constant 67 : index
    %293 = memref.load %arg0[%c67] : memref<144xf32, #tpu.memory_space<smem>>
    %294 = vector.broadcast %293 : f32 to vector<8x128xf32>
    %295 = arith.mulf %251, %294 : vector<8x128xf32>
    %296 = arith.addf %217, %295 : vector<8x128xf32>
    %c68 = arith.constant 68 : index
    %297 = memref.load %arg0[%c68] : memref<144xf32, #tpu.memory_space<smem>>
    %298 = vector.broadcast %297 : f32 to vector<8x128xf32>
    %299 = arith.mulf %251, %298 : vector<8x128xf32>
    %300 = arith.addf %225, %299 : vector<8x128xf32>
    %c66 = arith.constant 66 : index
    %301 = memref.load %arg0[%c66] : memref<144xf32, #tpu.memory_space<smem>>
    %302 = vector.broadcast %301 : f32 to vector<8x128xf32>
    %303 = arith.mulf %252, %302 : vector<8x128xf32>
    %304 = arith.addf %300, %303 : vector<8x128xf32>
    %c70 = arith.constant 70 : index
    %305 = memref.load %arg0[%c70] : memref<144xf32, #tpu.memory_space<smem>>
    %306 = vector.broadcast %305 : f32 to vector<8x128xf32>
    %307 = arith.mulf %251, %306 : vector<8x128xf32>
    %308 = arith.addf %233, %307 : vector<8x128xf32>
    %c64 = arith.constant 64 : index
    %309 = memref.load %arg0[%c64] : memref<144xf32, #tpu.memory_space<smem>>
    %310 = vector.broadcast %309 : f32 to vector<8x128xf32>
    %311 = arith.mulf %255, %310 : vector<8x128xf32>
    %312 = arith.addf %308, %311 : vector<8x128xf32>
    %c71 = arith.constant 71 : index
    %313 = memref.load %arg0[%c71] : memref<144xf32, #tpu.memory_space<smem>>
    %314 = vector.broadcast %313 : f32 to vector<8x128xf32>
    %315 = arith.mulf %251, %314 : vector<8x128xf32>
    %316 = arith.addf %249, %315 : vector<8x128xf32>
    %c69 = arith.constant 69 : index
    %317 = memref.load %arg0[%c69] : memref<144xf32, #tpu.memory_space<smem>>
    %318 = vector.broadcast %317 : f32 to vector<8x128xf32>
    %319 = arith.mulf %252, %318 : vector<8x128xf32>
    %320 = arith.addf %316, %319 : vector<8x128xf32>
    %c65 = arith.constant 65 : index
    %321 = memref.load %arg0[%c65] : memref<144xf32, #tpu.memory_space<smem>>
    %322 = vector.broadcast %321 : f32 to vector<8x128xf32>
    %323 = arith.mulf %255, %322 : vector<8x128xf32>
    %324 = arith.addf %320, %323 : vector<8x128xf32>
    %c63 = arith.constant 63 : index
    %325 = memref.load %arg0[%c63] : memref<144xf32, #tpu.memory_space<smem>>
    %326 = vector.broadcast %325 : f32 to vector<8x128xf32>
    %327 = arith.mulf %256, %326 : vector<8x128xf32>
    %328 = arith.addf %324, %327 : vector<8x128xf32>
    %c4_28 = arith.constant 4 : index
    %c0_29 = arith.constant 0 : index
    %c0_30 = arith.constant 0 : index
    %329 = vector.load %arg2[%c4_28, %c0_29, %c0_30] : memref<8x8x128xf32, #tpu.memory_space<vmem>>, vector<1x8x128xf32>
    %330 = vector.shape_cast %329 : vector<1x8x128xf32> to vector<8x128xf32>
    %c127_i32_31 = arith.constant 127 : i32
    %331 = tpu.dynamic_rotate %330 by %c127_i32_31 dim 1 : vector<8x128xf32>, i32 -> vector<8x128xf32>
    %c96_i32_32 = arith.constant 96 : i32
    %332 = tpu.dynamic_rotate %330 by %c96_i32_32 dim 1 : vector<8x128xf32>, i32 -> vector<8x128xf32>
    %c7_i32_33 = arith.constant 7 : i32
    %333 = tpu.dynamic_rotate %332 by %c7_i32_33 dim 0 : vector<8x128xf32>, i32 -> vector<8x128xf32>
    %334 = arith.select %2, %333, %332 : vector<8x128xi1>, vector<8x128xf32>
    %c127_i32_34 = arith.constant 127 : i32
    %335 = tpu.dynamic_rotate %334 by %c127_i32_34 dim 1 : vector<8x128xf32>, i32 -> vector<8x128xf32>
    %c76 = arith.constant 76 : index
    %336 = memref.load %arg0[%c76] : memref<144xf32, #tpu.memory_space<smem>>
    %337 = vector.broadcast %336 : f32 to vector<8x128xf32>
    %338 = arith.mulf %330, %337 : vector<8x128xf32>
    %339 = arith.addf %260, %338 : vector<8x128xf32>
    %c77 = arith.constant 77 : index
    %340 = memref.load %arg0[%c77] : memref<144xf32, #tpu.memory_space<smem>>
    %341 = vector.broadcast %340 : f32 to vector<8x128xf32>
    %342 = arith.mulf %330, %341 : vector<8x128xf32>
    %343 = arith.addf %268, %342 : vector<8x128xf32>
    %c75 = arith.constant 75 : index
    %344 = memref.load %arg0[%c75] : memref<144xf32, #tpu.memory_space<smem>>
    %345 = vector.broadcast %344 : f32 to vector<8x128xf32>
    %346 = arith.mulf %331, %345 : vector<8x128xf32>
    %347 = arith.addf %343, %346 : vector<8x128xf32>
    %c79 = arith.constant 79 : index
    %348 = memref.load %arg0[%c79] : memref<144xf32, #tpu.memory_space<smem>>
    %349 = vector.broadcast %348 : f32 to vector<8x128xf32>
    %350 = arith.mulf %330, %349 : vector<8x128xf32>
    %351 = arith.addf %276, %350 : vector<8x128xf32>
    %c73 = arith.constant 73 : index
    %352 = memref.load %arg0[%c73] : memref<144xf32, #tpu.memory_space<smem>>
    %353 = vector.broadcast %352 : f32 to vector<8x128xf32>
    %354 = arith.mulf %334, %353 : vector<8x128xf32>
    %355 = arith.addf %351, %354 : vector<8x128xf32>
    %c80 = arith.constant 80 : index
    %356 = memref.load %arg0[%c80] : memref<144xf32, #tpu.memory_space<smem>>
    %357 = vector.broadcast %356 : f32 to vector<8x128xf32>
    %358 = arith.mulf %330, %357 : vector<8x128xf32>
    %359 = arith.addf %292, %358 : vector<8x128xf32>
    %c78 = arith.constant 78 : index
    %360 = memref.load %arg0[%c78] : memref<144xf32, #tpu.memory_space<smem>>
    %361 = vector.broadcast %360 : f32 to vector<8x128xf32>
    %362 = arith.mulf %331, %361 : vector<8x128xf32>
    %363 = arith.addf %359, %362 : vector<8x128xf32>
    %c74 = arith.constant 74 : index
    %364 = memref.load %arg0[%c74] : memref<144xf32, #tpu.memory_space<smem>>
    %365 = vector.broadcast %364 : f32 to vector<8x128xf32>
    %366 = arith.mulf %334, %365 : vector<8x128xf32>
    %367 = arith.addf %363, %366 : vector<8x128xf32>
    %c72 = arith.constant 72 : index
    %368 = memref.load %arg0[%c72] : memref<144xf32, #tpu.memory_space<smem>>
    %369 = vector.broadcast %368 : f32 to vector<8x128xf32>
    %370 = arith.mulf %335, %369 : vector<8x128xf32>
    %371 = arith.addf %367, %370 : vector<8x128xf32>
    %c85 = arith.constant 85 : index
    %372 = memref.load %arg0[%c85] : memref<144xf32, #tpu.memory_space<smem>>
    %373 = vector.broadcast %372 : f32 to vector<8x128xf32>
    %374 = arith.mulf %330, %373 : vector<8x128xf32>
    %375 = arith.addf %296, %374 : vector<8x128xf32>
    %c86 = arith.constant 86 : index
    %376 = memref.load %arg0[%c86] : memref<144xf32, #tpu.memory_space<smem>>
    %377 = vector.broadcast %376 : f32 to vector<8x128xf32>
    %378 = arith.mulf %330, %377 : vector<8x128xf32>
    %379 = arith.addf %304, %378 : vector<8x128xf32>
    %c84 = arith.constant 84 : index
    %380 = memref.load %arg0[%c84] : memref<144xf32, #tpu.memory_space<smem>>
    %381 = vector.broadcast %380 : f32 to vector<8x128xf32>
    %382 = arith.mulf %331, %381 : vector<8x128xf32>
    %383 = arith.addf %379, %382 : vector<8x128xf32>
    %c88 = arith.constant 88 : index
    %384 = memref.load %arg0[%c88] : memref<144xf32, #tpu.memory_space<smem>>
    %385 = vector.broadcast %384 : f32 to vector<8x128xf32>
    %386 = arith.mulf %330, %385 : vector<8x128xf32>
    %387 = arith.addf %312, %386 : vector<8x128xf32>
    %c82 = arith.constant 82 : index
    %388 = memref.load %arg0[%c82] : memref<144xf32, #tpu.memory_space<smem>>
    %389 = vector.broadcast %388 : f32 to vector<8x128xf32>
    %390 = arith.mulf %334, %389 : vector<8x128xf32>
    %391 = arith.addf %387, %390 : vector<8x128xf32>
    %c89 = arith.constant 89 : index
    %392 = memref.load %arg0[%c89] : memref<144xf32, #tpu.memory_space<smem>>
    %393 = vector.broadcast %392 : f32 to vector<8x128xf32>
    %394 = arith.mulf %330, %393 : vector<8x128xf32>
    %395 = arith.addf %328, %394 : vector<8x128xf32>
    %c87 = arith.constant 87 : index
    %396 = memref.load %arg0[%c87] : memref<144xf32, #tpu.memory_space<smem>>
    %397 = vector.broadcast %396 : f32 to vector<8x128xf32>
    %398 = arith.mulf %331, %397 : vector<8x128xf32>
    %399 = arith.addf %395, %398 : vector<8x128xf32>
    %c83 = arith.constant 83 : index
    %400 = memref.load %arg0[%c83] : memref<144xf32, #tpu.memory_space<smem>>
    %401 = vector.broadcast %400 : f32 to vector<8x128xf32>
    %402 = arith.mulf %334, %401 : vector<8x128xf32>
    %403 = arith.addf %399, %402 : vector<8x128xf32>
    %c81 = arith.constant 81 : index
    %404 = memref.load %arg0[%c81] : memref<144xf32, #tpu.memory_space<smem>>
    %405 = vector.broadcast %404 : f32 to vector<8x128xf32>
    %406 = arith.mulf %335, %405 : vector<8x128xf32>
    %407 = arith.addf %403, %406 : vector<8x128xf32>
    %c5_35 = arith.constant 5 : index
    %c0_36 = arith.constant 0 : index
    %c0_37 = arith.constant 0 : index
    %408 = vector.load %arg2[%c5_35, %c0_36, %c0_37] : memref<8x8x128xf32, #tpu.memory_space<vmem>>, vector<1x8x128xf32>
    %409 = vector.shape_cast %408 : vector<1x8x128xf32> to vector<8x128xf32>
    %c127_i32_38 = arith.constant 127 : i32
    %410 = tpu.dynamic_rotate %409 by %c127_i32_38 dim 1 : vector<8x128xf32>, i32 -> vector<8x128xf32>
    %c96_i32_39 = arith.constant 96 : i32
    %411 = tpu.dynamic_rotate %409 by %c96_i32_39 dim 1 : vector<8x128xf32>, i32 -> vector<8x128xf32>
    %c7_i32_40 = arith.constant 7 : i32
    %412 = tpu.dynamic_rotate %411 by %c7_i32_40 dim 0 : vector<8x128xf32>, i32 -> vector<8x128xf32>
    %413 = arith.select %2, %412, %411 : vector<8x128xi1>, vector<8x128xf32>
    %c127_i32_41 = arith.constant 127 : i32
    %414 = tpu.dynamic_rotate %413 by %c127_i32_41 dim 1 : vector<8x128xf32>, i32 -> vector<8x128xf32>
    %c94 = arith.constant 94 : index
    %415 = memref.load %arg0[%c94] : memref<144xf32, #tpu.memory_space<smem>>
    %416 = vector.broadcast %415 : f32 to vector<8x128xf32>
    %417 = arith.mulf %409, %416 : vector<8x128xf32>
    %418 = arith.addf %339, %417 : vector<8x128xf32>
    %c95 = arith.constant 95 : index
    %419 = memref.load %arg0[%c95] : memref<144xf32, #tpu.memory_space<smem>>
    %420 = vector.broadcast %419 : f32 to vector<8x128xf32>
    %421 = arith.mulf %409, %420 : vector<8x128xf32>
    %422 = arith.addf %347, %421 : vector<8x128xf32>
    %c93 = arith.constant 93 : index
    %423 = memref.load %arg0[%c93] : memref<144xf32, #tpu.memory_space<smem>>
    %424 = vector.broadcast %423 : f32 to vector<8x128xf32>
    %425 = arith.mulf %410, %424 : vector<8x128xf32>
    %426 = arith.addf %422, %425 : vector<8x128xf32>
    %c97 = arith.constant 97 : index
    %427 = memref.load %arg0[%c97] : memref<144xf32, #tpu.memory_space<smem>>
    %428 = vector.broadcast %427 : f32 to vector<8x128xf32>
    %429 = arith.mulf %409, %428 : vector<8x128xf32>
    %430 = arith.addf %355, %429 : vector<8x128xf32>
    %c91 = arith.constant 91 : index
    %431 = memref.load %arg0[%c91] : memref<144xf32, #tpu.memory_space<smem>>
    %432 = vector.broadcast %431 : f32 to vector<8x128xf32>
    %433 = arith.mulf %413, %432 : vector<8x128xf32>
    %434 = arith.addf %430, %433 : vector<8x128xf32>
    %c98 = arith.constant 98 : index
    %435 = memref.load %arg0[%c98] : memref<144xf32, #tpu.memory_space<smem>>
    %436 = vector.broadcast %435 : f32 to vector<8x128xf32>
    %437 = arith.mulf %409, %436 : vector<8x128xf32>
    %438 = arith.addf %371, %437 : vector<8x128xf32>
    %c96 = arith.constant 96 : index
    %439 = memref.load %arg0[%c96] : memref<144xf32, #tpu.memory_space<smem>>
    %440 = vector.broadcast %439 : f32 to vector<8x128xf32>
    %441 = arith.mulf %410, %440 : vector<8x128xf32>
    %442 = arith.addf %438, %441 : vector<8x128xf32>
    %c92 = arith.constant 92 : index
    %443 = memref.load %arg0[%c92] : memref<144xf32, #tpu.memory_space<smem>>
    %444 = vector.broadcast %443 : f32 to vector<8x128xf32>
    %445 = arith.mulf %413, %444 : vector<8x128xf32>
    %446 = arith.addf %442, %445 : vector<8x128xf32>
    %c90 = arith.constant 90 : index
    %447 = memref.load %arg0[%c90] : memref<144xf32, #tpu.memory_space<smem>>
    %448 = vector.broadcast %447 : f32 to vector<8x128xf32>
    %449 = arith.mulf %414, %448 : vector<8x128xf32>
    %450 = arith.addf %446, %449 : vector<8x128xf32>
    %c103 = arith.constant 103 : index
    %451 = memref.load %arg0[%c103] : memref<144xf32, #tpu.memory_space<smem>>
    %452 = vector.broadcast %451 : f32 to vector<8x128xf32>
    %453 = arith.mulf %409, %452 : vector<8x128xf32>
    %454 = arith.addf %375, %453 : vector<8x128xf32>
    %c104 = arith.constant 104 : index
    %455 = memref.load %arg0[%c104] : memref<144xf32, #tpu.memory_space<smem>>
    %456 = vector.broadcast %455 : f32 to vector<8x128xf32>
    %457 = arith.mulf %409, %456 : vector<8x128xf32>
    %458 = arith.addf %383, %457 : vector<8x128xf32>
    %c102 = arith.constant 102 : index
    %459 = memref.load %arg0[%c102] : memref<144xf32, #tpu.memory_space<smem>>
    %460 = vector.broadcast %459 : f32 to vector<8x128xf32>
    %461 = arith.mulf %410, %460 : vector<8x128xf32>
    %462 = arith.addf %458, %461 : vector<8x128xf32>
    %c106 = arith.constant 106 : index
    %463 = memref.load %arg0[%c106] : memref<144xf32, #tpu.memory_space<smem>>
    %464 = vector.broadcast %463 : f32 to vector<8x128xf32>
    %465 = arith.mulf %409, %464 : vector<8x128xf32>
    %466 = arith.addf %391, %465 : vector<8x128xf32>
    %c100 = arith.constant 100 : index
    %467 = memref.load %arg0[%c100] : memref<144xf32, #tpu.memory_space<smem>>
    %468 = vector.broadcast %467 : f32 to vector<8x128xf32>
    %469 = arith.mulf %413, %468 : vector<8x128xf32>
    %470 = arith.addf %466, %469 : vector<8x128xf32>
    %c107 = arith.constant 107 : index
    %471 = memref.load %arg0[%c107] : memref<144xf32, #tpu.memory_space<smem>>
    %472 = vector.broadcast %471 : f32 to vector<8x128xf32>
    %473 = arith.mulf %409, %472 : vector<8x128xf32>
    %474 = arith.addf %407, %473 : vector<8x128xf32>
    %c105 = arith.constant 105 : index
    %475 = memref.load %arg0[%c105] : memref<144xf32, #tpu.memory_space<smem>>
    %476 = vector.broadcast %475 : f32 to vector<8x128xf32>
    %477 = arith.mulf %410, %476 : vector<8x128xf32>
    %478 = arith.addf %474, %477 : vector<8x128xf32>
    %c101 = arith.constant 101 : index
    %479 = memref.load %arg0[%c101] : memref<144xf32, #tpu.memory_space<smem>>
    %480 = vector.broadcast %479 : f32 to vector<8x128xf32>
    %481 = arith.mulf %413, %480 : vector<8x128xf32>
    %482 = arith.addf %478, %481 : vector<8x128xf32>
    %c99 = arith.constant 99 : index
    %483 = memref.load %arg0[%c99] : memref<144xf32, #tpu.memory_space<smem>>
    %484 = vector.broadcast %483 : f32 to vector<8x128xf32>
    %485 = arith.mulf %414, %484 : vector<8x128xf32>
    %486 = arith.addf %482, %485 : vector<8x128xf32>
    %c6_42 = arith.constant 6 : index
    %c0_43 = arith.constant 0 : index
    %c0_44 = arith.constant 0 : index
    %487 = vector.load %arg2[%c6_42, %c0_43, %c0_44] : memref<8x8x128xf32, #tpu.memory_space<vmem>>, vector<1x8x128xf32>
    %488 = vector.shape_cast %487 : vector<1x8x128xf32> to vector<8x128xf32>
    %c127_i32_45 = arith.constant 127 : i32
    %489 = tpu.dynamic_rotate %488 by %c127_i32_45 dim 1 : vector<8x128xf32>, i32 -> vector<8x128xf32>
    %c96_i32_46 = arith.constant 96 : i32
    %490 = tpu.dynamic_rotate %488 by %c96_i32_46 dim 1 : vector<8x128xf32>, i32 -> vector<8x128xf32>
    %c7_i32_47 = arith.constant 7 : i32
    %491 = tpu.dynamic_rotate %490 by %c7_i32_47 dim 0 : vector<8x128xf32>, i32 -> vector<8x128xf32>
    %492 = arith.select %2, %491, %490 : vector<8x128xi1>, vector<8x128xf32>
    %c127_i32_48 = arith.constant 127 : i32
    %493 = tpu.dynamic_rotate %492 by %c127_i32_48 dim 1 : vector<8x128xf32>, i32 -> vector<8x128xf32>
    %c112 = arith.constant 112 : index
    %494 = memref.load %arg0[%c112] : memref<144xf32, #tpu.memory_space<smem>>
    %495 = vector.broadcast %494 : f32 to vector<8x128xf32>
    %496 = arith.mulf %488, %495 : vector<8x128xf32>
    %497 = arith.addf %418, %496 : vector<8x128xf32>
    %c113 = arith.constant 113 : index
    %498 = memref.load %arg0[%c113] : memref<144xf32, #tpu.memory_space<smem>>
    %499 = vector.broadcast %498 : f32 to vector<8x128xf32>
    %500 = arith.mulf %488, %499 : vector<8x128xf32>
    %501 = arith.addf %426, %500 : vector<8x128xf32>
    %c111 = arith.constant 111 : index
    %502 = memref.load %arg0[%c111] : memref<144xf32, #tpu.memory_space<smem>>
    %503 = vector.broadcast %502 : f32 to vector<8x128xf32>
    %504 = arith.mulf %489, %503 : vector<8x128xf32>
    %505 = arith.addf %501, %504 : vector<8x128xf32>
    %c115 = arith.constant 115 : index
    %506 = memref.load %arg0[%c115] : memref<144xf32, #tpu.memory_space<smem>>
    %507 = vector.broadcast %506 : f32 to vector<8x128xf32>
    %508 = arith.mulf %488, %507 : vector<8x128xf32>
    %509 = arith.addf %434, %508 : vector<8x128xf32>
    %c109 = arith.constant 109 : index
    %510 = memref.load %arg0[%c109] : memref<144xf32, #tpu.memory_space<smem>>
    %511 = vector.broadcast %510 : f32 to vector<8x128xf32>
    %512 = arith.mulf %492, %511 : vector<8x128xf32>
    %513 = arith.addf %509, %512 : vector<8x128xf32>
    %c116 = arith.constant 116 : index
    %514 = memref.load %arg0[%c116] : memref<144xf32, #tpu.memory_space<smem>>
    %515 = vector.broadcast %514 : f32 to vector<8x128xf32>
    %516 = arith.mulf %488, %515 : vector<8x128xf32>
    %517 = arith.addf %450, %516 : vector<8x128xf32>
    %c114 = arith.constant 114 : index
    %518 = memref.load %arg0[%c114] : memref<144xf32, #tpu.memory_space<smem>>
    %519 = vector.broadcast %518 : f32 to vector<8x128xf32>
    %520 = arith.mulf %489, %519 : vector<8x128xf32>
    %521 = arith.addf %517, %520 : vector<8x128xf32>
    %c110 = arith.constant 110 : index
    %522 = memref.load %arg0[%c110] : memref<144xf32, #tpu.memory_space<smem>>
    %523 = vector.broadcast %522 : f32 to vector<8x128xf32>
    %524 = arith.mulf %492, %523 : vector<8x128xf32>
    %525 = arith.addf %521, %524 : vector<8x128xf32>
    %c108 = arith.constant 108 : index
    %526 = memref.load %arg0[%c108] : memref<144xf32, #tpu.memory_space<smem>>
    %527 = vector.broadcast %526 : f32 to vector<8x128xf32>
    %528 = arith.mulf %493, %527 : vector<8x128xf32>
    %529 = arith.addf %525, %528 : vector<8x128xf32>
    %c121 = arith.constant 121 : index
    %530 = memref.load %arg0[%c121] : memref<144xf32, #tpu.memory_space<smem>>
    %531 = vector.broadcast %530 : f32 to vector<8x128xf32>
    %532 = arith.mulf %488, %531 : vector<8x128xf32>
    %533 = arith.addf %454, %532 : vector<8x128xf32>
    %c122 = arith.constant 122 : index
    %534 = memref.load %arg0[%c122] : memref<144xf32, #tpu.memory_space<smem>>
    %535 = vector.broadcast %534 : f32 to vector<8x128xf32>
    %536 = arith.mulf %488, %535 : vector<8x128xf32>
    %537 = arith.addf %462, %536 : vector<8x128xf32>
    %c120 = arith.constant 120 : index
    %538 = memref.load %arg0[%c120] : memref<144xf32, #tpu.memory_space<smem>>
    %539 = vector.broadcast %538 : f32 to vector<8x128xf32>
    %540 = arith.mulf %489, %539 : vector<8x128xf32>
    %541 = arith.addf %537, %540 : vector<8x128xf32>
    %c124 = arith.constant 124 : index
    %542 = memref.load %arg0[%c124] : memref<144xf32, #tpu.memory_space<smem>>
    %543 = vector.broadcast %542 : f32 to vector<8x128xf32>
    %544 = arith.mulf %488, %543 : vector<8x128xf32>
    %545 = arith.addf %470, %544 : vector<8x128xf32>
    %c118 = arith.constant 118 : index
    %546 = memref.load %arg0[%c118] : memref<144xf32, #tpu.memory_space<smem>>
    %547 = vector.broadcast %546 : f32 to vector<8x128xf32>
    %548 = arith.mulf %492, %547 : vector<8x128xf32>
    %549 = arith.addf %545, %548 : vector<8x128xf32>
    %c125 = arith.constant 125 : index
    %550 = memref.load %arg0[%c125] : memref<144xf32, #tpu.memory_space<smem>>
    %551 = vector.broadcast %550 : f32 to vector<8x128xf32>
    %552 = arith.mulf %488, %551 : vector<8x128xf32>
    %553 = arith.addf %486, %552 : vector<8x128xf32>
    %c123 = arith.constant 123 : index
    %554 = memref.load %arg0[%c123] : memref<144xf32, #tpu.memory_space<smem>>
    %555 = vector.broadcast %554 : f32 to vector<8x128xf32>
    %556 = arith.mulf %489, %555 : vector<8x128xf32>
    %557 = arith.addf %553, %556 : vector<8x128xf32>
    %c119 = arith.constant 119 : index
    %558 = memref.load %arg0[%c119] : memref<144xf32, #tpu.memory_space<smem>>
    %559 = vector.broadcast %558 : f32 to vector<8x128xf32>
    %560 = arith.mulf %492, %559 : vector<8x128xf32>
    %561 = arith.addf %557, %560 : vector<8x128xf32>
    %c117 = arith.constant 117 : index
    %562 = memref.load %arg0[%c117] : memref<144xf32, #tpu.memory_space<smem>>
    %563 = vector.broadcast %562 : f32 to vector<8x128xf32>
    %564 = arith.mulf %493, %563 : vector<8x128xf32>
    %565 = arith.addf %561, %564 : vector<8x128xf32>
    %c7_49 = arith.constant 7 : index
    %c0_50 = arith.constant 0 : index
    %c0_51 = arith.constant 0 : index
    %566 = vector.load %arg2[%c7_49, %c0_50, %c0_51] : memref<8x8x128xf32, #tpu.memory_space<vmem>>, vector<1x8x128xf32>
    %567 = vector.shape_cast %566 : vector<1x8x128xf32> to vector<8x128xf32>
    %c127_i32_52 = arith.constant 127 : i32
    %568 = tpu.dynamic_rotate %567 by %c127_i32_52 dim 1 : vector<8x128xf32>, i32 -> vector<8x128xf32>
    %c96_i32_53 = arith.constant 96 : i32
    %569 = tpu.dynamic_rotate %567 by %c96_i32_53 dim 1 : vector<8x128xf32>, i32 -> vector<8x128xf32>
    %c7_i32_54 = arith.constant 7 : i32
    %570 = tpu.dynamic_rotate %569 by %c7_i32_54 dim 0 : vector<8x128xf32>, i32 -> vector<8x128xf32>
    %571 = arith.select %2, %570, %569 : vector<8x128xi1>, vector<8x128xf32>
    %c127_i32_55 = arith.constant 127 : i32
    %572 = tpu.dynamic_rotate %571 by %c127_i32_55 dim 1 : vector<8x128xf32>, i32 -> vector<8x128xf32>
    %c130 = arith.constant 130 : index
    %573 = memref.load %arg0[%c130] : memref<144xf32, #tpu.memory_space<smem>>
    %574 = vector.broadcast %573 : f32 to vector<8x128xf32>
    %575 = arith.mulf %567, %574 : vector<8x128xf32>
    %576 = arith.addf %497, %575 : vector<8x128xf32>
    %c131 = arith.constant 131 : index
    %577 = memref.load %arg0[%c131] : memref<144xf32, #tpu.memory_space<smem>>
    %578 = vector.broadcast %577 : f32 to vector<8x128xf32>
    %579 = arith.mulf %567, %578 : vector<8x128xf32>
    %580 = arith.addf %505, %579 : vector<8x128xf32>
    %c129 = arith.constant 129 : index
    %581 = memref.load %arg0[%c129] : memref<144xf32, #tpu.memory_space<smem>>
    %582 = vector.broadcast %581 : f32 to vector<8x128xf32>
    %583 = arith.mulf %568, %582 : vector<8x128xf32>
    %584 = arith.addf %580, %583 : vector<8x128xf32>
    %c133 = arith.constant 133 : index
    %585 = memref.load %arg0[%c133] : memref<144xf32, #tpu.memory_space<smem>>
    %586 = vector.broadcast %585 : f32 to vector<8x128xf32>
    %587 = arith.mulf %567, %586 : vector<8x128xf32>
    %588 = arith.addf %513, %587 : vector<8x128xf32>
    %c127 = arith.constant 127 : index
    %589 = memref.load %arg0[%c127] : memref<144xf32, #tpu.memory_space<smem>>
    %590 = vector.broadcast %589 : f32 to vector<8x128xf32>
    %591 = arith.mulf %571, %590 : vector<8x128xf32>
    %592 = arith.addf %588, %591 : vector<8x128xf32>
    %c134 = arith.constant 134 : index
    %593 = memref.load %arg0[%c134] : memref<144xf32, #tpu.memory_space<smem>>
    %594 = vector.broadcast %593 : f32 to vector<8x128xf32>
    %595 = arith.mulf %567, %594 : vector<8x128xf32>
    %596 = arith.addf %529, %595 : vector<8x128xf32>
    %c132 = arith.constant 132 : index
    %597 = memref.load %arg0[%c132] : memref<144xf32, #tpu.memory_space<smem>>
    %598 = vector.broadcast %597 : f32 to vector<8x128xf32>
    %599 = arith.mulf %568, %598 : vector<8x128xf32>
    %600 = arith.addf %596, %599 : vector<8x128xf32>
    %c128 = arith.constant 128 : index
    %601 = memref.load %arg0[%c128] : memref<144xf32, #tpu.memory_space<smem>>
    %602 = vector.broadcast %601 : f32 to vector<8x128xf32>
    %603 = arith.mulf %571, %602 : vector<8x128xf32>
    %604 = arith.addf %600, %603 : vector<8x128xf32>
    %c126 = arith.constant 126 : index
    %605 = memref.load %arg0[%c126] : memref<144xf32, #tpu.memory_space<smem>>
    %606 = vector.broadcast %605 : f32 to vector<8x128xf32>
    %607 = arith.mulf %572, %606 : vector<8x128xf32>
    %608 = arith.addf %604, %607 : vector<8x128xf32>
    %c139 = arith.constant 139 : index
    %609 = memref.load %arg0[%c139] : memref<144xf32, #tpu.memory_space<smem>>
    %610 = vector.broadcast %609 : f32 to vector<8x128xf32>
    %611 = arith.mulf %567, %610 : vector<8x128xf32>
    %612 = arith.addf %533, %611 : vector<8x128xf32>
    %c140 = arith.constant 140 : index
    %613 = memref.load %arg0[%c140] : memref<144xf32, #tpu.memory_space<smem>>
    %614 = vector.broadcast %613 : f32 to vector<8x128xf32>
    %615 = arith.mulf %567, %614 : vector<8x128xf32>
    %616 = arith.addf %541, %615 : vector<8x128xf32>
    %c138 = arith.constant 138 : index
    %617 = memref.load %arg0[%c138] : memref<144xf32, #tpu.memory_space<smem>>
    %618 = vector.broadcast %617 : f32 to vector<8x128xf32>
    %619 = arith.mulf %568, %618 : vector<8x128xf32>
    %620 = arith.addf %616, %619 : vector<8x128xf32>
    %c142 = arith.constant 142 : index
    %621 = memref.load %arg0[%c142] : memref<144xf32, #tpu.memory_space<smem>>
    %622 = vector.broadcast %621 : f32 to vector<8x128xf32>
    %623 = arith.mulf %567, %622 : vector<8x128xf32>
    %624 = arith.addf %549, %623 : vector<8x128xf32>
    %c136 = arith.constant 136 : index
    %625 = memref.load %arg0[%c136] : memref<144xf32, #tpu.memory_space<smem>>
    %626 = vector.broadcast %625 : f32 to vector<8x128xf32>
    %627 = arith.mulf %571, %626 : vector<8x128xf32>
    %628 = arith.addf %624, %627 : vector<8x128xf32>
    %c143 = arith.constant 143 : index
    %629 = memref.load %arg0[%c143] : memref<144xf32, #tpu.memory_space<smem>>
    %630 = vector.broadcast %629 : f32 to vector<8x128xf32>
    %631 = arith.mulf %567, %630 : vector<8x128xf32>
    %632 = arith.addf %565, %631 : vector<8x128xf32>
    %c141 = arith.constant 141 : index
    %633 = memref.load %arg0[%c141] : memref<144xf32, #tpu.memory_space<smem>>
    %634 = vector.broadcast %633 : f32 to vector<8x128xf32>
    %635 = arith.mulf %568, %634 : vector<8x128xf32>
    %636 = arith.addf %632, %635 : vector<8x128xf32>
    %c137 = arith.constant 137 : index
    %637 = memref.load %arg0[%c137] : memref<144xf32, #tpu.memory_space<smem>>
    %638 = vector.broadcast %637 : f32 to vector<8x128xf32>
    %639 = arith.mulf %571, %638 : vector<8x128xf32>
    %640 = arith.addf %636, %639 : vector<8x128xf32>
    %c135 = arith.constant 135 : index
    %641 = memref.load %arg0[%c135] : memref<144xf32, #tpu.memory_space<smem>>
    %642 = vector.broadcast %641 : f32 to vector<8x128xf32>
    %643 = arith.mulf %572, %642 : vector<8x128xf32>
    %644 = arith.addf %640, %643 : vector<8x128xf32>
    %c0_56 = arith.constant 0 : index
    %c0_57 = arith.constant 0 : index
    %c0_58 = arith.constant 0 : index
    %c0_59 = arith.constant 0 : index
    %645 = vector.load %arg3[%c0_56, %c0_57, %c0_58, %c0_59] : memref<2x4x8x128xf32, #tpu.memory_space<vmem>>, vector<1x1x8x128xf32>
    %646 = vector.shape_cast %645 : vector<1x1x8x128xf32> to vector<8x128xf32>
    %647 = vector.shape_cast %576 : vector<8x128xf32> to vector<1x1x8x128xf32>
    tpu.vector_store %arg3[%c0_56, %c0_57, %c0_58, %c0_59], %647 {strides = array<i32>} : memref<2x4x8x128xf32, #tpu.memory_space<vmem>>, vector<1x1x8x128xf32>,
    %c0_60 = arith.constant 0 : index
    %c1_61 = arith.constant 1 : index
    %c0_62 = arith.constant 0 : index
    %c0_63 = arith.constant 0 : index
    %648 = vector.load %arg3[%c0_60, %c1_61, %c0_62, %c0_63] : memref<2x4x8x128xf32, #tpu.memory_space<vmem>>, vector<1x1x8x128xf32>
    %649 = vector.shape_cast %648 : vector<1x1x8x128xf32> to vector<8x128xf32>
    %650 = vector.shape_cast %584 : vector<8x128xf32> to vector<1x1x8x128xf32>
    tpu.vector_store %arg3[%c0_60, %c1_61, %c0_62, %c0_63], %650 {strides = array<i32>} : memref<2x4x8x128xf32, #tpu.memory_space<vmem>>, vector<1x1x8x128xf32>,
    %c0_64 = arith.constant 0 : index
    %c2_65 = arith.constant 2 : index
    %c0_66 = arith.constant 0 : index
    %c0_67 = arith.constant 0 : index
    %651 = vector.load %arg3[%c0_64, %c2_65, %c0_66, %c0_67] : memref<2x4x8x128xf32, #tpu.memory_space<vmem>>, vector<1x1x8x128xf32>
    %652 = vector.shape_cast %651 : vector<1x1x8x128xf32> to vector<8x128xf32>
    %653 = vector.shape_cast %592 : vector<8x128xf32> to vector<1x1x8x128xf32>
    tpu.vector_store %arg3[%c0_64, %c2_65, %c0_66, %c0_67], %653 {strides = array<i32>} : memref<2x4x8x128xf32, #tpu.memory_space<vmem>>, vector<1x1x8x128xf32>,
    %c0_68 = arith.constant 0 : index
    %c3_69 = arith.constant 3 : index
    %c0_70 = arith.constant 0 : index
    %c0_71 = arith.constant 0 : index
    %654 = vector.load %arg3[%c0_68, %c3_69, %c0_70, %c0_71] : memref<2x4x8x128xf32, #tpu.memory_space<vmem>>, vector<1x1x8x128xf32>
    %655 = vector.shape_cast %654 : vector<1x1x8x128xf32> to vector<8x128xf32>
    %656 = vector.shape_cast %608 : vector<8x128xf32> to vector<1x1x8x128xf32>
    tpu.vector_store %arg3[%c0_68, %c3_69, %c0_70, %c0_71], %656 {strides = array<i32>} : memref<2x4x8x128xf32, #tpu.memory_space<vmem>>, vector<1x1x8x128xf32>,
    %c1_72 = arith.constant 1 : index
    %c0_73 = arith.constant 0 : index
    %c0_74 = arith.constant 0 : index
    %c0_75 = arith.constant 0 : index
    %657 = vector.load %arg3[%c1_72, %c0_73, %c0_74, %c0_75] : memref<2x4x8x128xf32, #tpu.memory_space<vmem>>, vector<1x1x8x128xf32>
    %658 = vector.shape_cast %657 : vector<1x1x8x128xf32> to vector<8x128xf32>
    %659 = vector.shape_cast %612 : vector<8x128xf32> to vector<1x1x8x128xf32>
    tpu.vector_store %arg3[%c1_72, %c0_73, %c0_74, %c0_75], %659 {strides = array<i32>} : memref<2x4x8x128xf32, #tpu.memory_space<vmem>>, vector<1x1x8x128xf32>,
    %c1_76 = arith.constant 1 : index
    %c1_77 = arith.constant 1 : index
    %c0_78 = arith.constant 0 : index
    %c0_79 = arith.constant 0 : index
    %660 = vector.load %arg3[%c1_76, %c1_77, %c0_78, %c0_79] : memref<2x4x8x128xf32, #tpu.memory_space<vmem>>, vector<1x1x8x128xf32>
    %661 = vector.shape_cast %660 : vector<1x1x8x128xf32> to vector<8x128xf32>
    %662 = vector.shape_cast %620 : vector<8x128xf32> to vector<1x1x8x128xf32>
    tpu.vector_store %arg3[%c1_76, %c1_77, %c0_78, %c0_79], %662 {strides = array<i32>} : memref<2x4x8x128xf32, #tpu.memory_space<vmem>>, vector<1x1x8x128xf32>,
    %c1_80 = arith.constant 1 : index
    %c2_81 = arith.constant 2 : index
    %c0_82 = arith.constant 0 : index
    %c0_83 = arith.constant 0 : index
    %663 = vector.load %arg3[%c1_80, %c2_81, %c0_82, %c0_83] : memref<2x4x8x128xf32, #tpu.memory_space<vmem>>, vector<1x1x8x128xf32>
    %664 = vector.shape_cast %663 : vector<1x1x8x128xf32> to vector<8x128xf32>
    %665 = vector.shape_cast %628 : vector<8x128xf32> to vector<1x1x8x128xf32>
    tpu.vector_store %arg3[%c1_80, %c2_81, %c0_82, %c0_83], %665 {strides = array<i32>} : memref<2x4x8x128xf32, #tpu.memory_space<vmem>>, vector<1x1x8x128xf32>,
    %c1_84 = arith.constant 1 : index
    %c3_85 = arith.constant 3 : index
    %c0_86 = arith.constant 0 : index
    %c0_87 = arith.constant 0 : index
    %666 = vector.load %arg3[%c1_84, %c3_85, %c0_86, %c0_87] : memref<2x4x8x128xf32, #tpu.memory_space<vmem>>, vector<1x1x8x128xf32>
    %667 = vector.shape_cast %666 : vector<1x1x8x128xf32> to vector<8x128xf32>
    %668 = vector.shape_cast %644 : vector<8x128xf32> to vector<1x1x8x128xf32>
    tpu.vector_store %arg3[%c1_84, %c3_85, %c0_86, %c0_87], %668 {strides = array<i32>} : memref<2x4x8x128xf32, #tpu.memory_space<vmem>>, vector<1x1x8x128xf32>,
    return
  }
}

</mosaic_0001>

<bundles_post_ra>
// kernel: squeeze.1
= control target key start
LH: loop header
LB: loop body
LE: loop exit
PB: predicated region body
PF: predicated region fallthrough
CT: control target
= control target key end

     0   :  { %2 = vsyncpa [#allocation1], 0  ;;  %s272_s6 = smov [#allocation0]   ;;  %s434_s0 = inlined_call_operand.hbm [shape: f32[1,8,32,32], index: 0, kind: input, shape index: {}]   ;;  %s435_s1 = inlined_call_operand.vmem [shape: f32[8,8,128], index: 1, kind: output, shape index: {}]  }
   0x1   :  { %s7_s7 = sshll.u32 %s272_s6, 4  ;;  %s248_s10 = scalar_lea.hbm %s434_s0, 4096  ;;  %s8_s7 = int_to_ptr.vmem [resolvable:$true] %s7_s7 }
   0x2   :  { %p249_p0 = scmp.ne.s32.totalorder %s434_s0, %s248_s10  ;;  %p252_p1 = scmp.lt.u32.totalorder %s248_s10, %s434_s0 }
   0x4   :  { %p254_p2 = pnand %p252_p1, %p249_p0 }
   0x6   :  { %257 = shalt.err (!%p254_p2)
}
   0x7   :  { %s258_s15 = scalar_lea.vmem %s8_s7, 4096  ;;  %p263_p4 = scmp.lt.s32.totalorder %s8_s7, %s8_s7 }
   0x8   :  { %p259_p3 = scmp.ne.s32.totalorder %s8_s7, %s258_s15  ;;  %p264_p5 = scmp.lt.s32.totalorder %s258_s15, %s258_s15 }
   0xa   :  { %p265_p6 = por %p264_p5, %p263_p4 }
   0xc   :  { %p266_p7 = pnand %p265_p6, %p259_p3 }
   0xe   :  { %269 = shalt.err (!%p266_p7)
}
   0xf   :  { %10 = dma.hbm_to_vmem [thread:$0]  %s434_s0, 4096, %s8_s7, [#allocation1]  }
  0x10   :  { %270 = dma.done.wait [#allocation1], 4096  }
  0x11   :  { %271 = vsyncadd [#allocation1], 4294963200  ;;  %v64_v0 = vld [vmem:[#allocation0 + $0x23] ss:$4 sm:$0xff]   ;;  %s273_s0 = smov 96   ;;  %vm13_vm0 = vcmask 261120  }
  0x12   :  { %v51_v1 = vld [vmem:[#allocation0 + $0x3] ss:$4 sm:$0xff]   ;;  %65 = vrot.lane.b32.xlu1 %v64_v0, %s273_s0  ;;  %v16_v7 = vld [vmem:[#allocation0 + $0x20] ss:$4 sm:$0xff]   ;;  %v112_v16 = vld [vmem:[#allocation0 + $0x82] ss:$4 sm:$0xff]  }
  0x13   :  { %52 = vrot.lane.b32.xlu0 %v51_v1, %s273_s0  ;;  %v71_v2 = vld [vmem:[#allocation0 + $0xa3] ss:$4 sm:$0xff]   ;;  %v12_v8 = vld [vmem:[#allocation0] ss:$4 sm:$0xff]   ;;  %216 = vst.msk [vmem:[%s435_s1 + $0x8] sm:$0xff] %vm13_vm0, %v16_v7   ;;  %s274_s5 = smov 64  }
  0x14   :  { %v57_v3 = vld [vmem:[#allocation0 + $0x83] ss:$4 sm:$0xff]   ;;  %v36_v9 = vld [vmem:[#allocation0 + $0xa0] ss:$4 sm:$0xff]   ;;  %14 = vst.msk [vmem:[%s435_s1] sm:$0xff] %vm13_vm0, %v12_v8   ;;  %s275_s6 = smov 32  }
  0x15   :  { %v85_v4 = vld [vmem:[#allocation0 + $0xc3] ss:$4 sm:$0xff]   ;;  %220 = vst.msk [vmem:[%s435_s1 + $0x28] sm:$0xff] %vm13_vm0, %v36_v9   ;;  %v31_v10 = vld [vmem:[#allocation0 + $0x80] ss:$4 sm:$0xff]   ;;  %vm54_vm1 = vcmask 1048320  }
  0x16   :  { %72 = vrot.lane.b32.xlu1 %v71_v2, %s273_s0  ;;  %v78_v5 = vld [vmem:[#allocation0 + $0x43] ss:$4 sm:$0xff]   ;;  %v41_v11 = vld [vmem:[#allocation0 + $0xc0] ss:$4 sm:$0xff]   ;;  %219 = vst.msk [vmem:[%s435_s1 + $0x20] sm:$0xff] %vm13_vm0, %v31_v10   ;;  %vm109_vm2 = vcmask 785920  }
  0x17   :  { %58 = vrot.lane.b32.xlu0 %v57_v3, %s273_s0  ;;  %v99_v6 = vld [vmem:[#allocation0 + $0xe3] ss:$4 sm:$0xff]   ;;  %v21_v12 = vld [vmem:[#allocation0 + $0x40] ss:$4 sm:$0xff]   ;;  %221 = vst.msk [vmem:[%s435_s1 + $0x30] sm:$0xff] %vm13_vm0, %v41_v11   ;;  %vm164_vm3 = vcmask 523520  }
  0x18   :  { %v92_v13 = vld [vmem:[#allocation0 + $0x63] ss:$4 sm:$0xff]   ;;  %217 = vst.msk [vmem:[%s435_s1 + $0x10] sm:$0xff] %vm13_vm0, %v21_v12   ;;  %v46_v14 = vld [vmem:[#allocation0 + $0xe0] ss:$4 sm:$0xff]  }
  0x19   :  { %v26_v15 = vld [vmem:[#allocation0 + $0x60] ss:$4 sm:$0xff]   ;;  %222 = vst.msk [vmem:[%s435_s1 + $0x38] sm:$0xff] %vm13_vm0, %v46_v14   ;;  %v106_v17 = vld [vmem:[#allocation0 + $0x2] ss:$4 sm:$0xff]  }
  0x1a   :  { %86 = vrot.lane.b32.xlu1 %v85_v4, %s273_s0  ;;  %218 = vst.msk [vmem:[%s435_s1 + $0x18] sm:$0xff] %vm13_vm0, %v26_v15   ;;  %v126_v18 = vld [vmem:[#allocation0 + $0xa2] ss:$4 sm:$0xff]   ;;  %v167_v24 = vld [vmem:[#allocation0 + $0x81] ss:$4 sm:$0xff]  }
  0x1b   :  { %79 = vrot.lane.b32.xlu0 %v78_v5, %s273_s0  ;;  %v119_v19 = vld [vmem:[#allocation0 + $0x22] ss:$4 sm:$0xff]   ;;  %v161_v25 = vld [vmem:[#allocation0 + $0x1] ss:$4 sm:$0xff]  }
  0x1c   :  { %v140_v20 = vld [vmem:[#allocation0 + $0xc2] ss:$4 sm:$0xff]   ;;  %v181_v26 = vld [vmem:[#allocation0 + $0xa1] ss:$4 sm:$0xff]  }
  0x1d   :  { %v133_v21 = vld [vmem:[#allocation0 + $0x42] ss:$4 sm:$0xff]   ;;  %v174_v27 = vld [vmem:[#allocation0 + $0x21] ss:$4 sm:$0xff]  }
  0x1e   :  { %100 = vrot.lane.b32.xlu1 %v99_v6, %s273_s0  ;;  %v154_v22 = vld [vmem:[#allocation0 + $0xe2] ss:$4 sm:$0xff]   ;;  %v195_v28 = vld [vmem:[#allocation0 + $0xc1] ss:$4 sm:$0xff]  }
  0x1f   :  { %93 = vrot.lane.b32.xlu0 %v92_v13, %s273_s0  ;;  %v147_v23 = vld [vmem:[#allocation0 + $0x62] ss:$4 sm:$0xff]   ;;  %v188_v29 = vld [vmem:[#allocation0 + $0x41] ss:$4 sm:$0xff]  }
  0x20   :  { %v209_v30 = vld [vmem:[#allocation0 + $0xe1] ss:$4 sm:$0xff]  }
  0x21   :  { %v202_v31 = vld [vmem:[#allocation0 + $0x61] ss:$4 sm:$0xff]  }
  0x22   :  { %113 = vrot.lane.b32.xlu1 %v112_v16, %s274_s5 }
  0x23   :  { %107 = vrot.lane.b32.xlu0 %v106_v17, %s274_s5 }
  0x26   :  { %127 = vrot.lane.b32.xlu1 %v126_v18, %s274_s5 }
  0x27   :  { %120 = vrot.lane.b32.xlu0 %v119_v19, %s274_s5 }
  0x2a   :  { %141 = vrot.lane.b32.xlu1 %v140_v20, %s274_s5 }
  0x2b   :  { %134 = vrot.lane.b32.xlu0 %v133_v21, %s274_s5 }
  0x2e   :  { %155 = vrot.lane.b32.xlu1 %v154_v22, %s274_s5 }
  0x2f   :  { %148 = vrot.lane.b32.xlu0 %v147_v23, %s274_s5 }
  0x32   :  { %168 = vrot.lane.b32.xlu1 %v167_v24, %s275_s6 }
  0x33   :  { %162 = vrot.lane.b32.xlu0 %v161_v25, %s275_s6 }
  0x36   :  { %182 = vrot.lane.b32.xlu1 %v181_v26, %s275_s6 }
  0x37   :  { %175 = vrot.lane.b32.xlu0 %v174_v27, %s275_s6 }
  0x3a   :  { %196 = vrot.lane.b32.xlu1 %v195_v28, %s275_s6 }
  0x3b   :  { %189 = vrot.lane.b32.xlu0 %v188_v29, %s275_s6 }
  0x3e   :  { %210 = vrot.lane.b32.xlu1 %v209_v30, %s275_s6 }
  0x3f   :  { %203 = vrot.lane.b32.xlu0 %v202_v31, %s275_s6 }
  0x84   :  { %v66_v32 = vpop.permute.xlu1 %65  }
  0x85   :  { %v53_v33 = vpop.permute.xlu0 %52   ;;  %224 = vst.msk [vmem:[%s435_s1 + $0x8] sm:$0xff] %vm54_vm1, %v66_v32  }
  0x86   :  { %55 = vst.msk [vmem:[%s435_s1] sm:$0xff] %vm54_vm1, %v53_v33  }
  0x88   :  { %v73_v34 = vpop.permute.xlu1 %72  }
  0x89   :  { %v59_v35 = vpop.permute.xlu0 %58   ;;  %225 = vst.msk [vmem:[%s435_s1 + $0x28] sm:$0xff] %vm54_vm1, %v73_v34  }
  0x8a   :  { %223 = vst.msk [vmem:[%s435_s1 + $0x20] sm:$0xff] %vm54_vm1, %v59_v35  }
  0x8c   :  { %v87_v36 = vpop.permute.xlu1 %86  }
  0x8d   :  { %v80_v37 = vpop.permute.xlu0 %79   ;;  %227 = vst.msk [vmem:[%s435_s1 + $0x30] sm:$0xff] %vm54_vm1, %v87_v36  }
  0x8e   :  { %226 = vst.msk [vmem:[%s435_s1 + $0x10] sm:$0xff] %vm54_vm1, %v80_v37  }
  0x90   :  { %v101_v38 = vpop.permute.xlu1 %100  }
  0x91   :  { %v94_v39 = vpop.permute.xlu0 %93   ;;  %229 = vst.msk [vmem:[%s435_s1 + $0x38] sm:$0xff] %vm54_vm1, %v101_v38  }
  0x92   :  { %228 = vst.msk [vmem:[%s435_s1 + $0x18] sm:$0xff] %vm54_vm1, %v94_v39  }
  0x94   :  { %v114_v40 = vpop.permute.xlu1 %113  }
  0x95   :  { %v108_v41 = vpop.permute.xlu0 %107   ;;  %230 = vst.msk [vmem:[%s435_s1 + $0x20] sm:$0xff] %vm109_vm2, %v114_v40  }
  0x96   :  { %110 = vst.msk [vmem:[%s435_s1] sm:$0xff] %vm109_vm2, %v108_v41  }
  0x98   :  { %v128_v42 = vpop.permute.xlu1 %127  }
  0x99   :  { %v121_v43 = vpop.permute.xlu0 %120   ;;  %232 = vst.msk [vmem:[%s435_s1 + $0x28] sm:$0xff] %vm109_vm2, %v128_v42  }
  0x9a   :  { %231 = vst.msk [vmem:[%s435_s1 + $0x8] sm:$0xff] %vm109_vm2, %v121_v43  }
  0x9c   :  { %v142_v44 = vpop.permute.xlu1 %141  }
  0x9d   :  { %v135_v45 = vpop.permute.xlu0 %134   ;;  %234 = vst.msk [vmem:[%s435_s1 + $0x30] sm:$0xff] %vm109_vm2, %v142_v44  }
  0x9e   :  { %233 = vst.msk [vmem:[%s435_s1 + $0x10] sm:$0xff] %vm109_vm2, %v135_v45  }
  0xa0   :  { %v156_v46 = vpop.permute.xlu1 %155  }
  0xa1   :  { %v149_v47 = vpop.permute.xlu0 %148   ;;  %236 = vst.msk [vmem:[%s435_s1 + $0x38] sm:$0xff] %vm109_vm2, %v156_v46  }
  0xa2   :  { %235 = vst.msk [vmem:[%s435_s1 + $0x18] sm:$0xff] %vm109_vm2, %v149_v47  }
  0xa4   :  { %v169_v48 = vpop.permute.xlu1 %168  }
  0xa5   :  { %v163_v49 = vpop.permute.xlu0 %162   ;;  %237 = vst.msk [vmem:[%s435_s1 + $0x20] sm:$0xff] %vm164_vm3, %v169_v48  }
  0xa6   :  { %165 = vst.msk [vmem:[%s435_s1] sm:$0xff] %vm164_vm3, %v163_v49  }
  0xa8   :  { %v183_v50 = vpop.permute.xlu1 %182  }
  0xa9   :  { %v176_v51 = vpop.permute.xlu0 %175   ;;  %239 = vst.msk [vmem:[%s435_s1 + $0x28] sm:$0xff] %vm164_vm3, %v183_v50  }
  0xaa   :  { %238 = vst.msk [vmem:[%s435_s1 + $0x8] sm:$0xff] %vm164_vm3, %v176_v51  }
  0xac   :  { %v197_v52 = vpop.permute.xlu1 %196  }
  0xad   :  { %v190_v53 = vpop.permute.xlu0 %189   ;;  %241 = vst.msk [vmem:[%s435_s1 + $0x30] sm:$0xff] %vm164_vm3, %v197_v52  }
  0xae   :  { %240 = vst.msk [vmem:[%s435_s1 + $0x10] sm:$0xff] %vm164_vm3, %v190_v53  }
  0xb0   :  { %v211_v54 = vpop.permute.xlu1 %210  }
  0xb1   :  { %v204_v55 = vpop.permute.xlu0 %203   ;;  %243 = vst.msk [vmem:[%s435_s1 + $0x38] sm:$0xff] %vm164_vm3, %v211_v54  }
  0xb2   :  { %242 = vst.msk [vmem:[%s435_s1 + $0x18] sm:$0xff] %vm164_vm3, %v204_v55  }
  0xb3   :  { %215 = vsyncpa [#allocation1], 1 }

// kernel: conv_transpose_plus3.1
= control target key start
LH: loop header
LB: loop body
LE: loop exit
PB: predicated region body
PF: predicated region fallthrough
CT: control target
= control target key end

     0   :  { %s1763_s0 = inlined_call_operand.vmem [shape: f32[144], index: 0, kind: input, shape index: {}]   ;;  %s1764_s1 = inlined_call_operand.vmem [shape: f32[2], index: 1, kind: input, shape index: {}]   ;;  %s1765_s2 = inlined_call_operand.vmem [shape: f32[8,8,128], index: 2, kind: input, shape index: {}]   ;;  %s1766_s3 = inlined_call_operand.vmem [shape: f32[2,4,8,128], index: 3, kind: output, shape index: {}]  }
   0x1   :  { %1775 = sst [smem:[#allocation10_spill]] %s1765_s2 }
   0x2   :  { %1776 = sst [smem:[#allocation11_spill]] %s1766_s3 }
   0x3   :  { %8 = vsyncpa [#allocation3], 0  ;;  %s16_s14 = sshll.u32 %s1763_s0, 4  ;;  %s17_s14 = int_to_ptr.vmem [resolvable:$true] %s16_s14 }
   0x4   :  { %9 = vsyncpa [#allocation5], 0  ;;  %s26_s17 = sshll.u32 %s1764_s1, 4  ;;  %s888_s18 = scalar_lea.vmem %s17_s14, 32  ;;  %s27_s17 = int_to_ptr.vmem [resolvable:$true] %s26_s17 }
   0x5   :  { %p889_p0 = scmp.ne.s32.totalorder %s17_s14, %s888_s18  ;;  %p893_p1 = scmp.lt.s32.totalorder %s17_s14, %s17_s14 }
   0x6   :  { %p894_p2 = scmp.lt.s32.totalorder %s888_s18, %s888_s18 }
   0x8   :  { %p895_p3 = por %p894_p2, %p893_p1 }
   0xa   :  { %p896_p4 = pnand %p895_p3, %p889_p0 }
   0xc   :  { %899 = shalt.err (!%p896_p4)
}
   0xd   :  { %s916_s19 = smov [#allocation2]   ;;  %s900_s20 = scalar_lea.vmem %s27_s17, 16 }
   0xe   :  { %19 = dma.vmem_to_smem %s17_s14, 32, %s916_s19, [#allocation3]  }
   0xf   :  { %p901_p5 = scmp.ne.s32.totalorder %s27_s17, %s900_s20  ;;  %p905_p6 = scmp.lt.s32.totalorder %s27_s17, %s27_s17 }
  0x10   :  { %p906_p7 = scmp.lt.s32.totalorder %s900_s20, %s900_s20 }
  0x12   :  { %p907_p8 = por %p906_p7, %p905_p6 }
  0x14   :  { %p908_p9 = pnand %p907_p8, %p901_p5 }
  0x16   :  { %911 = shalt.err (!%p908_p9)
}
  0x17   :  { %s917_s0 = smov [#allocation4]  }
  0x18   :  { %29 = dma.vmem_to_smem %s27_s17, 16, %s917_s0, [#allocation5]  }
  0x19   :  { %912 = dma.done.wait [#allocation3], 32  }
  0x1a   :  { %913 = vsyncadd [#allocation3], 4294967264 }
  0x1b   :  { %914 = dma.done.wait [#allocation5], 16  }
  0x1c   :  { %915 = vsyncadd [#allocation5], 4294967280 }
  0x1d   :  { %38 = sfence }
  0x1e   :  { %v949_v0 = vld [vmem:[%s1765_s2] sm:$0xff]  ;;  %v954_v1 = vld [vmem:[%s1765_s2 + $0x10] sm:$0xff]  ;;  %s918_s24 = smov 96   ;;  %v963_v2 = vld [vmem:[%s1765_s2 + $0x8] sm:$0xff]  ;;  %s970_s29 = sld [smem:[#allocation2 + $0x4]] }
  0x1f   :  { %47 = vrot.lane.b32.xlu0 %v949_v0, %s918_s24  ;;  %213 = vrot.lane.b32.xlu1 %v954_v1, %s918_s24  ;;  %v968_v3 = vld [vmem:[%s1765_s2 + $0x18] sm:$0xff]  ;;  %s972_s30 = sld [smem:[#allocation2 + $0x7]]  ;;  %s974_s4 = sld [smem:[#allocation2 + $0xd]]  ;;  %v987_v4 = vld [vmem:[%s1765_s2 + $0x20] sm:$0xff] }
  0x20   :  { %s976_s5 = sld [smem:[#allocation2 + $0x10]]  ;;  %s982_s6 = sld [smem:[#allocation2 + $0x16]]  ;;  %v992_v5 = vld [vmem:[%s1765_s2 + $0x28] sm:$0xff]  ;;  %v1009_v6 = vld [vmem:[%s1765_s2 + $0x30] sm:$0xff]  ;;  %v1014_v7 = vld [vmem:[%s1765_s2 + $0x38] sm:$0xff] }
  0x21   :  { %s994_s11 = sld [smem:[#allocation2 + $0x1f]]  ;;  %s996_s12 = sld [smem:[#allocation2 + $0x28]] }
  0x22   :  { %s998_s13 = sld [smem:[#allocation2 + $0x31]]  ;;  %s1004_s14 = sld [smem:[#allocation2 + $0x3a]] }
  0x23   :  { %131 = vrot.lane.b32.xlu0 %v963_v2, %s918_s24  ;;  %295 = vrot.lane.b32.xlu1 %v968_v3, %s918_s24  ;;  %s1016_s19 = sld [smem:[#allocation2 + $0x43]]  ;;  %s1020_s20 = sld [smem:[#allocation2 + $0x4c]] }
  0x24   :  { %v54_v8 = vstv %s970_s29  ;;  %s42_s0 = sld [smem:[#allocation4]]  ;;  %s1024_s1 = sld [smem:[#allocation2 + $0x55]] }
  0x25   :  { %v67_v9 = vstv %s972_s30  ;;  %v91_v10 = vstv %s974_s4  ;;  %s722_s21 = sld [smem:[#allocation4 + $0x1]]  ;;  %s1031_s22 = sld [smem:[#allocation2 + $0x5e]]  ;;  %v55_v15 = vmul.f32 %v54_v8, %v949_v0 }
  0x26   :  { %v104_v11 = vstv %s976_s5  ;;  %v138_v12 = vstv %s982_s6  ;;  %s1035_s23 = sld [smem:[#allocation2 + $0x67]]  ;;  %v68_v16 = vmul.f32 %v67_v9, %v949_v0  ;;  %s1039_s25 = sld [smem:[#allocation2 + $0x70]]  ;;  %v92_v17 = vmul.f32 %v91_v10, %v949_v0 }
  0x27   :  { %377 = vrot.lane.b32.xlu0 %v987_v4, %s918_s24  ;;  %459 = vrot.lane.b32.xlu1 %v992_v5, %s918_s24  ;;  %v174_v13 = vstv %s994_s11  ;;  %v220_v14 = vstv %s996_s12  ;;  %v105_v18 = vmul.f32 %v104_v11, %v949_v0  ;;  %v139_v19 = vmul.f32 %v963_v2, %v138_v12  ;;  %s1767_s26 = smov 127   ;;  %s1052_s27 = sld [smem:[#allocation2 + $0x82]] }
  0x28   :  { %v256_v20 = vstv %s998_s13  ;;  %v175_v21 = vmul.f32 %v963_v2, %v174_v13  ;;  %v221_v22 = vmul.f32 %v954_v1, %v220_v14  ;;  %v302_v23 = vstv %s1004_s14  ;;  %s1055_s28 = sld [smem:[#allocation2 + $0x8b]]  ;;  %s724_s29 = sld [smem:[#allocation2 + $0x5]] }
  0x29   :  { %v338_v25 = vstv %s1016_s19  ;;  %v257_v29 = vmul.f32 %v954_v1, %v256_v20  ;;  %v384_v30 = vstv %s1020_s20  ;;  %v303_v33 = vmul.f32 %v968_v3, %v302_v23  ;;  %s732_s30 = sld [smem:[#allocation2 + $0xe]]  ;;  %s728_s4 = sld [smem:[#allocation2 + $0x8]] }
  0x2a   :  { %v56_v24 = vstv %s42_s0  ;;  %v420_v34 = vstv %s1024_s1  ;;  %v339_v36 = vmul.f32 %v968_v3, %v338_v25  ;;  %v385_v39 = vmul.f32 %v987_v4, %v384_v30  ;;  %s736_s7 = sld [smem:[#allocation2 + $0x11]]  ;;  %s1114_s11 = sld [smem:[#allocation2 + $0xa]] }
  0x2b   :  { %541 = vrot.lane.b32.xlu0 %v1009_v6, %s918_s24  ;;  %623 = vrot.lane.b32.xlu1 %v1014_v7, %s918_s24  ;;  %s1045_s24 = sld [smem:[#allocation2 + $0x79]]  ;;  %v57_v26 = vadd.f32 %v56_v24, %v55_v15  ;;  %v1057_v27 = vadd.f32 %v68_v16, %v56_v24  ;;  %v93_v28 = vstv %s722_s21  ;;  %v466_v37 = vstv %s1031_s22  ;;  %s1118_s13 = sld [smem:[#allocation2 + $0x13]] }
  0x2c   :  { %v94_v31 = vadd.f32 %v93_v28, %v92_v17  ;;  %v1061_v32 = vadd.f32 %v105_v18, %v93_v28  ;;  %v502_v40 = vstv %s1035_s23  ;;  %v421_v42 = vmul.f32 %v987_v4, %v420_v34  ;;  %s1112_s10 = sld [smem:[#allocation2 + $0x1]]  ;;  %s1120_s14 = sld [smem:[#allocation2 + $0x22]] }
  0x2d   :  { %v140_v35 = vadd.f32 %v139_v19, %v57_v26  ;;  %v548_v43 = vstv %s1039_s25  ;;  %v467_v45 = vmul.f32 %v992_v5, %v466_v37  ;;  %v503_v48 = vmul.f32 %v992_v5, %v502_v40  ;;  %s1116_s12 = sld [smem:[#allocation2 + $0x19]]  ;;  %s1122_s15 = sld [smem:[#allocation2 + $0x1c]] }
  0x2e   :  { %v176_v38 = vadd.f32 %v175_v21, %v94_v31  ;;  %v630_v49 = vstv %s1052_s27  ;;  %v549_v51 = vmul.f32 %v1009_v6, %v548_v43  ;;  %v666_v52 = vstv %s1055_s28  ;;  %s1124_s16 = sld [smem:[#allocation2 + $0x2b]]  ;;  %s1126_s17 = sld [smem:[#allocation2 + $0x25]] }
  0x2f   :  { %45 = vrot.lane.b32.xlu0 %v949_v0, %s1767_s26  ;;  %v222_v41 = vadd.f32 %v221_v22, %v140_v35  ;;  %v631_v56 = vmul.f32 %v1014_v7, %v630_v49  ;;  %v59_v58 = vstv %s724_s29  ;;  %v667_v59 = vmul.f32 %v1014_v7, %v666_v52  ;;  %s1128_s18 = sld [smem:[#allocation2 + $0x34]]  ;;  %s1130_s19 = sld [smem:[#allocation2 + $0x2e]] }
  0x30   :  { %v258_v44 = vadd.f32 %v257_v29, %v176_v38  ;;  %v96_v61 = vstv %s732_s30  ;;  %v60_v62 = vmul.f32 %v59_v58, %v949_v0  ;;  %v75_v14 = vstv %s728_s4  ;;  %s1132_s20 = sld [smem:[#allocation2 + $0x49]]  ;;  %s1134_s0 = sld [smem:[#allocation2 + $0x52]] }
  0x31   :  { %v584_v46 = vstv %s1045_s24  ;;  %v304_v47 = vadd.f32 %v303_v33, %v222_v41  ;;  %v97_v8 = vmul.f32 %v96_v61, %v949_v0  ;;  %v76_v15 = vmul.f32 %v75_v14, %v949_v0  ;;  %s1136_s1 = sld [smem:[#allocation2 + $0x3d]]  ;;  %s1138_s21 = sld [smem:[#allocation2 + $0x37]] }
  0x32   :  { %v340_v50 = vadd.f32 %v339_v36, %v258_v44  ;;  %v585_v54 = vmul.f32 %v1009_v6, %v584_v46  ;;  %v1088_v10 = vadd.f32 %v60_v62, %v56_v24  ;;  %v112_v16 = vstv %s736_s7  ;;  %s1140_s22 = sld [smem:[#allocation2 + $0x46]]  ;;  %s1142_s23 = sld [smem:[#allocation2 + $0x40]] }
  0x33   :  { %129 = vrot.lane.b32.xlu0 %v963_v2, %s1767_s26  ;;  %v386_v53 = vadd.f32 %v385_v39, %v304_v47  ;;  %v1090_v12 = vadd.f32 %v97_v8, %v93_v28  ;;  %v1105_v17 = vadd.f32 %v76_v15, %v56_v24  ;;  %v113_v18 = vmul.f32 %v112_v16, %v949_v0  ;;  %s1144_s25 = sld [smem:[#allocation2 + $0x4f]]  ;;  %s1146_s24 = sld [smem:[#allocation2 + $0x58]] }
  0x34   :  { %v422_v55 = vadd.f32 %v421_v42, %v340_v50  ;;  %v39_v0 = vlaneseq  ;;  %s1148_s27 = sld [smem:[#allocation2 + $0x6d]]  ;;  %s1150_s28 = sld [smem:[#allocation2 + $0x76]]  ;;  %v150_v21 = vstv %s1116_s12  ;;  %v186_v22 = vstv %s1120_s14 }
  0x35   :  { %v468_v57 = vadd.f32 %v467_v45, %v386_v53  ;;  %v1108_v19 = vadd.f32 %v113_v18, %v93_v28  ;;  %s1152_s29 = sld [smem:[#allocation2 + $0x3]]  ;;  %s1154_s30 = sld [smem:[#allocation2 + $0x6]]  ;;  %v71_v23 = vstv %s1112_s10  ;;  %v108_v24 = vstv %s1114_s11 }
  0x36   :  { %v504_v60 = vadd.f32 %v503_v48, %v422_v55  ;;  %1777 = sst [smem:[#allocation8_spill]] %s1134_s0  ;;  %v1156_v20 = vand.u32 127, %v39_v0  ;;  %s1158_s4 = sld [smem:[#allocation2 + $0xc]]  ;;  %v232_v25 = vstv %s1124_s16  ;;  %v1181_v26 = vmul.f32 %v963_v2, %v150_v21 }
  0x37   :  { %211 = vrot.lane.b32.xlu0 %v954_v1, %s1767_s26  ;;  %v550_v63 = vadd.f32 %v549_v51, %v468_v57  ;;  %s1160_s5 = sld [smem:[#allocation2 + $0xf]]  ;;  %s1163_s6 = sld [smem:[#allocation2 + $0x61]]  ;;  %v154_v28 = vstv %s1118_s13  ;;  %v190_v29 = vstv %s1122_s15  ;;  %v268_v30 = vstv %s1128_s18 }
  0x38   :  { %v586_v9 = vadd.f32 %v585_v54, %v504_v60  ;;  %s1165_s7 = sld [smem:[#allocation2 + $0x5b]]  ;;  %s1168_s8 = sld [smem:[#allocation2 + $0x6a]]  ;;  %vm41_vm0 = vcmp.ge.s32.totalorder %v1156_v20, 96  ;;  %v1191_v31 = vmul.f32 %v963_v2, %v186_v22  ;;  %v236_v33 = vstv %s1126_s17 }
  0x39   :  { %v632_v11 = vadd.f32 %v631_v56, %v550_v63  ;;  %s1170_s9 = sld [smem:[#allocation2 + $0x73]]  ;;  %s1177_s12 = sld [smem:[#allocation2 + $0x85]]  ;;  %v314_v34 = vstv %s1136_s1  ;;  %v350_v35 = vstv %s1140_s22  ;;  %v1199_v36 = vmul.f32 %v954_v1, %v232_v25 }
  0x3a   :  { %v668_v13 = vadd.f32 %v667_v59, %v586_v9  ;;  %1778 = sst [smem:[#allocation9_spill]] %s1148_s27  ;;  %s1186_s14 = sld [smem:[#allocation2 + $0x64]]  ;;  %v272_v37 = vstv %s1130_s19  ;;  %v396_v38 = vstv %s1144_s25  ;;  %v432_v39 = vstv %s1146_s24 }
  0x3b   :  { %293 = vrot.lane.b32.xlu0 %v968_v3, %s1767_s26  ;;  %701 = vst [vmem:[%s1766_s3] sm:$0xff] %v632_v11  ;;  %s1188_s16 = sld [smem:[#allocation2 + $0x8e]]  ;;  %s1196_s2 = sld [smem:[#allocation2 + $0x17]]  ;;  %v1209_v40 = vmul.f32 %v954_v1, %v268_v30  ;;  %v400_v41 = vstv %s1132_s20  ;;  %v436_v42 = vstv %s1134_s0  ;;  %v1217_v44 = vmul.f32 %v968_v3, %v314_v34 }
  0x3c   :  { %876 = vst [vmem:[%s1766_s3 + $0x20] sm:$0xff] %v668_v13  ;;  %s1204_s18 = sld [smem:[#allocation2 + $0x7f]]  ;;  %s1206_s3 = sld [smem:[#allocation2 + $0x20]]  ;;  %v318_v43 = vstv %s1138_s21  ;;  %v1220_v45 = vmul.f32 %v968_v3, %v350_v35  ;;  %v354_v46 = vstv %s1142_s23  ;;  %v1227_v48 = vmul.f32 %v987_v4, %v396_v38 }
  0x3d   :  { %s1214_s1 = sld [smem:[#allocation2 + $0x88]]  ;;  %s1224_s22 = sld [smem:[#allocation2 + $0x15]]  ;;  %v1230_v49 = vmul.f32 %v987_v4, %v432_v39  ;;  %v478_v51 = vstv %s1163_s6  ;;  %v63_v52 = vstv %s1152_s29  ;;  %v79_v53 = vstv %s1154_s30 }
  0x3e   :  { %s1234_s25 = sld [smem:[#allocation2 + $0x1e]]  ;;  %s1236_s24 = sld [smem:[#allocation2 + $0x2]]  ;;  %v514_v54 = vstv %s1168_s8  ;;  %v100_v56 = vstv %s1158_s4  ;;  %v116_v57 = vstv %s1160_s5  ;;  %v1253_v62 = vmul.f32 %v992_v5, %v478_v51 }
  0x3f   :  { %375 = vrot.lane.b32.xlu0 %v987_v4, %s1767_s26  ;;  %v560_v55 = vstv %s1170_s9  ;;  %s1242_s27 = sld [smem:[#allocation2 + $0xb]]  ;;  %s1244_s0 = sld [smem:[#allocation2 + $0x29]]  ;;  %v642_v59 = vstv %s1177_s12  ;;  %v482_v63 = vstv %s1165_s7  ;;  %v1259_v13 = vmul.f32 %v992_v5, %v514_v54 }
  0x40   :  { %s1250_s6 = sld [smem:[#allocation2 + $0x32]]  ;;  %v518_v8 = vstv %s1186_s14  ;;  %v1262_v14 = vmul.f32 %v1009_v6, %v560_v55  ;;  %s1267_s8 = sld [smem:[#allocation2 + $0x44]]  ;;  %v1273_v18 = vmul.f32 %v1014_v7, %v642_v59 }
  0x41   :  { %v678_v9 = vstv %s1188_s16  ;;  %v142_v15 = vstv %s1196_s2  ;;  %s1285_s2 = sld [smem:[#allocation2 + $0x27]]  ;;  %s1287_s9 = sld [smem:[#allocation2 + $0x30]] }
  0x42   :  { %v178_v21 = vstv %s1206_s3  ;;  %v1282_v30 = vmul.f32 %v1014_v7, %v678_v9  ;;  %s1779_s3 = smov 127   ;;  %v1298_v54 = vmul.f32 %v963_v2, %v142_v15  ;;  %s1306_s10 = sld [smem:[#allocation2 + $0x39]] }
  0x43   :  { %457 = vrot.lane.b32.xlu0 %v992_v5, %s1767_s26  ;;  %v1302_v59 = vmul.f32 %v963_v2, %v178_v21  ;;  %s1308_s11 = sld [smem:[#allocation2 + $0x42]]  ;;  %s1323_s12 = sld [smem:[#allocation2 + $0x4d]] }
  0x44   :  { %s1325_s16 = sld [smem:[#allocation2 + $0x4b]]  ;;  %s1383_s15 = sld [smem:[#allocation2 + $0x56]] }
  0x45   :  { %v224_v15 = vstv %s1244_s0  ;;  %s1411_s17 = sld [smem:[#allocation2 + $0x54]]  ;;  %s1782_s19 = sld [smem:[#allocation9_spill]] }
  0x46   :  { %v260_v50 = vstv %s1250_s6  ;;  %s1437_s20 = sld [smem:[#allocation2 + $0x5f]]  ;;  %s1468_s0 = sld [smem:[#allocation2 + $0x5d]] }
  0x47   :  { %539 = vrot.lane.b32.xlu0 %v1009_v6, %s1767_s26  ;;  %v264_v55 = vstv %s1287_s9  ;;  %s1473_s21 = sld [smem:[#allocation2 + $0x68]]  ;;  %s1475_s23 = sld [smem:[#allocation2 + $0x66]] }
  0x48   :  { %s1502_s29 = sld [smem:[#allocation2 + $0x7a]]  ;;  %s1504_s30 = sld [smem:[#allocation2 + $0x78]] }
  0x49   :  { %s856_s4 = sld [smem:[#allocation2 + $0x83]]  ;;  %s1788_s14 = sld [smem:[#allocation11_spill]] }
  0x4a   :  { %s86_s9 = sld [smem:[#allocation2]]  ;;  %s1553_s13 = sld [smem:[#allocation2 + $0x14]] }
  0x4b   :  { %621 = vrot.lane.b32.xlu0 %v1014_v7, %s1767_s26  ;;  %s1175_s26 = sld [smem:[#allocation2 + $0x7c]]  ;;  %s1591_s5 = sld [smem:[#allocation2 + $0x2d]] }
  0x4c   :  { %s1599_s7 = sld [smem:[#allocation2 + $0x3c]]  ;;  %s1619_s6 = sld [smem:[#allocation2 + $0x36]] }
  0x51   :  { %v596_v58 = vstv %s1175_s26  ;;  %s1265_s26 = sld [smem:[#allocation2 + $0x3b]] }
  0x52   :  { %v1270_v16 = vmul.f32 %v1009_v6, %v596_v58 }
  0x91   :  { %v48_v60 = vpop.permute.xlu0 %47  ;;  %v214_v61 = vpop.permute.xlu1 %213 }
  0x92   :  { %v49_v11 = vrot.slane %v48_v60, 1  ;;  %v215_v25 = vrot.slane %v214_v61, 1 }
  0x94   :  { %v1279_v22 = vsel %vm41_vm0, %v49_v11, %v48_v60  ;;  %v83_v60 = vstv %s1236_s24  ;;  %v120_v11 = vstv %s1242_s27  ;;  %v1320_v21 = vsel %vm41_vm0, %v215_v25, %v214_v61  ;;  %s1486_s27 = sld [smem:[#allocation2 + $0x71]]  ;;  %s866_s24 = sld [smem:[#allocation2 + $0x8a]] }
  0x95   :  { %v72_v35 = vmul.f32 %v71_v23, %v1279_v22  ;;  %v109_v38 = vmul.f32 %v108_v24, %v1279_v22  ;;  %v132_v39 = vpop.permute.xlu0 %131  ;;  %51 = vrot.lane.b32.xlu1 %v1279_v22, %s1779_s3  ;;  %v296_v51 = vpop.permute.xlu1 %295  ;;  %v228_v23 = vstv %s1285_s2  ;;  %s1629_s2 = sld [smem:[#allocation2 + $0x57]] }
  0x96   :  { %v133_v58 = vrot.slane %v132_v39, 1  ;;  %v297_v0 = vrot.slane %v296_v51, 1 }
  0x97   :  { %v73_v24 = vadd.f32 %v72_v35, %v1057_v27  ;;  %v110_v9 = vadd.f32 %v109_v38, %v1061_v32 }
  0x98   :  { %v1316_v34 = vsel %vm41_vm0, %v133_v58, %v132_v39  ;;  %v1338_v58 = vmul.f32 %v954_v1, %v224_v15  ;;  %v1354_v15 = vmul.f32 %v954_v1, %v260_v50 }
  0x99   :  { %v152_v27 = vadd.f32 %v1181_v26, %v73_v24  ;;  %v155_v32 = vmul.f32 %v154_v28, %v1316_v34  ;;  %v188_v35 = vadd.f32 %v1191_v31, %v110_v9  ;;  %v191_v61 = vmul.f32 %v190_v29, %v1316_v34  ;;  %v378_v25 = vpop.permute.xlu0 %377  ;;  %135 = vrot.lane.b32.xlu1 %v1316_v34, %s1779_s3  ;;  %v460_v39 = vpop.permute.xlu1 %459 }
  0x9a   :  { %v379_v38 = vrot.slane %v378_v25, 1  ;;  %v306_v26 = vstv %s1265_s26  ;;  %v342_v24 = vstv %s1267_s8  ;;  %v237_v31 = vmul.f32 %v236_v33, %v1320_v21  ;;  %s1621_s26 = sld [smem:[#allocation2 + $0x3f]]  ;;  %s1627_s8 = sld [smem:[#allocation2 + $0x4e]] }
  0x9b   :  { %v156_v47 = vadd.f32 %v155_v32, %v152_v27  ;;  %v192_v28 = vadd.f32 %v191_v61, %v188_v35  ;;  %v273_v29 = vmul.f32 %v272_v37, %v1320_v21  ;;  %v1350_v9 = vsel %vm41_vm0, %v297_v0, %v296_v51 }
  0x9c   :  { %v461_v37 = vrot.slane %v460_v39, 1  ;;  %v1362_v0 = vmul.f32 %v968_v3, %v306_v26  ;;  %v1366_v50 = vsel %vm41_vm0, %v379_v38, %v378_v25  ;;  %v310_v51 = vstv %s1306_s10  ;;  %s746_s10 = sld [smem:[#allocation2 + $0x1a]] }
  0x9d   :  { %v234_v27 = vadd.f32 %v1199_v36, %v156_v47  ;;  %v270_v32 = vadd.f32 %v1209_v40, %v192_v28  ;;  %v542_v33 = vpop.permute.xlu0 %541  ;;  %217 = vrot.lane.b32.xlu1 %v1320_v21, %s1779_s3  ;;  %v1370_v36 = vmul.f32 %v968_v3, %v342_v24  ;;  %v346_v47 = vstv %s1308_s11  ;;  %s755_s11 = sld [smem:[#allocation2 + $0x23]] }
  0x9e   :  { %v319_v61 = vmul.f32 %v318_v43, %v1350_v9  ;;  %v355_v26 = vmul.f32 %v354_v46, %v1350_v9  ;;  %v84_v25 = vmul.f32 %v83_v60, %v1279_v22  ;;  %v121_v38 = vmul.f32 %v120_v11, %v1279_v22 }
  0x9f   :  { %v238_v40 = vadd.f32 %v237_v31, %v234_v27  ;;  %v274_v35 = vadd.f32 %v273_v29, %v270_v32  ;;  %v388_v24 = vstv %s1323_s12  ;;  %v392_v28 = vstv %s1325_s16  ;;  %s747_s12 = sld [smem:[#allocation2 + $0x18]]  ;;  %s756_s16 = sld [smem:[#allocation2 + $0x21]] }
  0xa0   :  { %v401_v31 = vmul.f32 %v400_v41, %v1366_v50  ;;  %v1392_v46 = vsel %vm41_vm0, %v461_v37, %v460_v39  ;;  %v543_v37 = vrot.slane %v542_v33, 1 }
  0xa1   :  { %v316_v29 = vadd.f32 %v1217_v44, %v238_v40  ;;  %v352_v43 = vadd.f32 %v1220_v45, %v274_v35  ;;  %v46_v27 = vpop.permute.xlu0 %45  ;;  %299 = vrot.lane.b32.xlu1 %v1350_v9, %s1779_s3  ;;  %v624_v44 = vpop.permute.xlu1 %623  ;;  %v437_v45 = vmul.f32 %v436_v42, %v1366_v50  ;;  %v483_v42 = vmul.f32 %v482_v63, %v1392_v46 }
  0xa2   :  { %v64_v22 = vmul.f32 %v63_v52, %v46_v27  ;;  %v80_v60 = vmul.f32 %v79_v53, %v46_v27  ;;  %v101_v11 = vmul.f32 %v100_v56, %v46_v27  ;;  %v117_v41 = vmul.f32 %v116_v57, %v46_v27 }
  0xa3   :  { %v320_v32 = vadd.f32 %v319_v61, %v316_v29  ;;  %v356_v39 = vadd.f32 %v355_v26, %v352_v43  ;;  %v625_v61 = vrot.slane %v624_v44, 1  ;;  %v1432_v63 = vsel %vm41_vm0, %v543_v37, %v542_v33 }
  0xa4   :  { %v65_v40 = vadd.f32 %v64_v22, %v1088_v10  ;;  %v102_v52 = vadd.f32 %v101_v11, %v1090_v12  ;;  %v81_v35 = vadd.f32 %v80_v60, %v1105_v17  ;;  %v118_v53 = vadd.f32 %v117_v41, %v1108_v19 }
  0xa5   :  { %v398_v56 = vadd.f32 %v1227_v48, %v320_v32  ;;  %v434_v57 = vadd.f32 %v1230_v49, %v356_v39  ;;  %381 = vrot.lane.b32.xlu1 %v1366_v50, %s1779_s3  ;;  %v1420_v10 = vpop.permute.xlu0 %129  ;;  %v519_v12 = vmul.f32 %v518_v8, %v1392_v46  ;;  %v1781_v19 = vstv %s1224_s22  ;;  %s857_s22 = sld [smem:[#allocation2 + $0x81]] }
  0xa6   :  { %v144_v17 = vadd.f32 %v1298_v54, %v65_v40  ;;  %v147_v48 = vmul.f32 %v1781_v19, %v1420_v10  ;;  %v180_v49 = vadd.f32 %v1302_v59, %v102_v52  ;;  %v1783_v43 = vstv %s1234_s25  ;;  %s865_s25 = sld [smem:[#allocation2 + $0x8c]] }
  0xa7   :  { %v402_v26 = vadd.f32 %v401_v31, %v398_v56  ;;  %v438_v29 = vadd.f32 %v437_v45, %v434_v57  ;;  %v183_v27 = vmul.f32 %v1783_v43, %v1420_v10  ;;  %v1439_v54 = vadd.f32 %v84_v25, %v81_v35 }
  0xa8   :  { %v148_v8 = vadd.f32 %v147_v48, %v144_v17  ;;  %v1441_v22 = vadd.f32 %v121_v38, %v118_v53  ;;  %v424_v59 = vstv %s1383_s15  ;;  %v1448_v31 = vsel %vm41_vm0, %v625_v61, %v624_v44  ;;  %s1555_s15 = sld [smem:[#allocation2 + $0x1d]] }
  0xa9   :  { %v480_v60 = vadd.f32 %v1253_v62, %v402_v26  ;;  %v516_v33 = vadd.f32 %v1259_v13, %v438_v29  ;;  %463 = vrot.lane.b32.xlu1 %v1392_v46, %s1779_s3  ;;  %v184_v11 = vadd.f32 %v183_v27, %v180_v49  ;;  %v1452_v41 = vpop.permute.xlu0 %211  ;;  %v1784_v25 = vstv %s1782_s19  ;;  %s1559_s19 = sld [smem:[#allocation2 + $0x35]] }
  0xaa   :  { %v565_v38 = vmul.f32 %v1784_v25, %v1432_v63  ;;  %v226_v45 = vadd.f32 %v1338_v58, %v148_v8  ;;  %v229_v62 = vmul.f32 %v228_v23, %v1452_v41  ;;  %v265_v20 = vmul.f32 %v264_v55, %v1452_v41 }
  0xab   :  { %v1785_v13 = vstv %s1150_s28  ;;  %v484_v32 = vadd.f32 %v483_v42, %v480_v60  ;;  %v520_v39 = vadd.f32 %v519_v12, %v516_v33  ;;  %v262_v37 = vadd.f32 %v1354_v15, %v184_v11  ;;  %s1500_s28 = sld [smem:[#allocation2 + $0x6f]] }
  0xac   :  { %v601_v44 = vmul.f32 %v1785_v13, %v1432_v63  ;;  %v230_v40 = vadd.f32 %v229_v62, %v226_v45  ;;  %v389_v58 = vmul.f32 %v987_v4, %v388_v24  ;;  %v425_v23 = vmul.f32 %v987_v4, %v424_v59 }
  0xad   :  { %v428_v52 = vstv %s1411_s17  ;;  %v562_v55 = vadd.f32 %v1262_v14, %v484_v32  ;;  %v598_v35 = vadd.f32 %v1270_v16, %v520_v39  ;;  %v1786_v15 = vstv %s1204_s18  ;;  %545 = vrot.lane.b32.xlu1 %v1432_v63, %s1779_s3  ;;  %v1484_v24 = vpop.permute.xlu0 %293  ;;  %s1557_s17 = sld [smem:[#allocation2 + $0x2c]]  ;;  %s1601_s18 = sld [smem:[#allocation2 + $0x45]] }
  0xae   :  { %v647_v53 = vmul.f32 %v1786_v15, %v1448_v31  ;;  %v266_v56 = vadd.f32 %v265_v20, %v262_v37  ;;  %v1787_v4 = vstv %s1214_s1  ;;  %v308_v42 = vadd.f32 %v1362_v0, %v230_v40  ;;  %s1607_s1 = sld [smem:[#allocation2 + $0x38]] }
  0xaf   :  { %v683_v57 = vmul.f32 %v1787_v4, %v1448_v31  ;;  %v311_v14 = vmul.f32 %v310_v51, %v1484_v24  ;;  %v347_v16 = vmul.f32 %v346_v47, %v1484_v24  ;;  %v566_v61 = vadd.f32 %v565_v38, %v562_v55 }
  0xb0   :  { %v602_v12 = vadd.f32 %v601_v44, %v598_v35  ;;  %v344_v17 = vadd.f32 %v1370_v36, %v266_v56  ;;  %v470_v19 = vstv %s1437_s20  ;;  %v474_v59 = vstv %s1468_s0  ;;  %s1561_s20 = sld [smem:[#allocation2 + $0x12]]  ;;  %s1563_s0 = sld [smem:[#allocation2 + $0x1b]] }
  0xb1   :  { %v312_v48 = vadd.f32 %v311_v14, %v308_v42  ;;  %v644_v0 = vadd.f32 %v1273_v18, %v566_v61  ;;  %627 = vrot.lane.b32.xlu1 %v1448_v31, %s1779_s3  ;;  %v1510_v36 = vpop.permute.xlu0 %375  ;;  %v471_v43 = vmul.f32 %v992_v5, %v470_v19  ;;  %v506_v60 = vstv %s1473_s21  ;;  %s739_s3 = sld [smem:[#allocation2 + $0x9]]  ;;  %s1565_s21 = sld [smem:[#allocation2 + $0x2a]] }
  0xb2   :  { %v680_v51 = vadd.f32 %v1282_v30, %v602_v12  ;;  %v348_v47 = vadd.f32 %v347_v16, %v344_v17  ;;  %v393_v26 = vmul.f32 %v392_v28, %v1510_v36  ;;  %v429_v29 = vmul.f32 %v428_v52, %v1510_v36 }
  0xb3   :  { %v390_v49 = vadd.f32 %v389_v58, %v312_v48  ;;  %v648_v27 = vadd.f32 %v647_v53, %v644_v0  ;;  %v510_v33 = vstv %s1475_s23  ;;  %v507_v11 = vmul.f32 %v992_v5, %v506_v60  ;;  %s1567_s23 = sld [smem:[#allocation2 + $0x33]] }
  0xb4   :  { %v684_v8 = vadd.f32 %v683_v57, %v680_v51  ;;  %v426_v18 = vadd.f32 %v425_v23, %v348_v47  ;;  %v552_v38 = vstv %s1486_s27  ;;  %v556_v32 = vstv %s1500_s28  ;;  %s1577_s27 = sld [smem:[#allocation2 + $0x26]]  ;;  %s1579_s28 = sld [smem:[#allocation2 + $0x2f]] }
  0xb5   :  { %v394_v30 = vadd.f32 %v393_v26, %v390_v49  ;;  %874 = vst [vmem:[%s1788_s14 + $0x10] sm:$0xff] %v648_v27  ;;  %v1527_v25 = vpop.permute.xlu0 %457  ;;  %v553_v44 = vmul.f32 %v1009_v6, %v552_v38  ;;  %v588_v37 = vstv %s1502_s29  ;;  %v592_v40 = vstv %s1504_s30  ;;  %s1583_s29 = sld [smem:[#allocation2 + $0x3e]]  ;;  %s1585_s30 = sld [smem:[#allocation2 + $0x47]] }
  0xb6   :  { %878 = vst [vmem:[%s1788_s14 + $0x30] sm:$0xff] %v684_v8  ;;  %v430_v28 = vadd.f32 %v429_v29, %v426_v18  ;;  %v475_v62 = vmul.f32 %v474_v59, %v1527_v25  ;;  %v511_v20 = vmul.f32 %v510_v33, %v1527_v25  ;;  %v589_v5 = vmul.f32 %v1009_v6, %v588_v37 }
  0xb7   :  { %v472_v45 = vadd.f32 %v471_v43, %v394_v30  ;;  %v634_v56 = vstv %s856_s4  ;;  %v638_v14 = vstv %s857_s22  ;;  %v670_v16 = vstv %s865_s25  ;;  %s1589_s4 = sld [smem:[#allocation2 + $0x24]]  ;;  %s1609_s22 = sld [smem:[#allocation2 + $0x41]] }
  0xb8   :  { %v508_v13 = vadd.f32 %v507_v11, %v430_v28  ;;  %v635_v57 = vmul.f32 %v1014_v7, %v634_v56  ;;  %v674_v61 = vstv %s866_s24  ;;  %v671_v6 = vmul.f32 %v1014_v7, %v670_v16  ;;  %s1613_s25 = sld [smem:[#allocation2 + $0x50]]  ;;  %s1615_s24 = sld [smem:[#allocation2 + $0x59]] }
  0xb9   :  { %v476_v39 = vadd.f32 %v475_v62, %v472_v45  ;;  %v1537_v23 = vpop.permute.xlu0 %539  ;;  %v87_v7 = vstv %s86_s9  ;;  %v124_v47 = vstv %s739_s3  ;;  %v158_v49 = vstv %s746_s10  ;;  %s1637_s9 = sld [smem:[#allocation2 + $0x4a]]  ;;  %s1639_s3 = sld [smem:[#allocation2 + $0x53]] }
  0xba   :  { %v512_v58 = vadd.f32 %v511_v20, %v508_v13  ;;  %v557_v55 = vmul.f32 %v556_v32, %v1537_v23  ;;  %v593_v35 = vmul.f32 %v592_v40, %v1537_v23  ;;  %v194_v26 = vstv %s755_s11  ;;  %s1643_s10 = sld [smem:[#allocation2 + $0x62]]  ;;  %s1645_s11 = sld [smem:[#allocation2 + $0x6b]] }
  0xbb   :  { %v554_v52 = vadd.f32 %v553_v44, %v476_v39  ;;  %v162_v29 = vstv %s747_s12  ;;  %v198_v43 = vstv %s756_s16  ;;  %v159_v8 = vmul.f32 %v963_v2, %v158_v49  ;;  %s1649_s12 = sld [smem:[#allocation2 + $0x48]]  ;;  %s1651_s16 = sld [smem:[#allocation2 + $0x51]] }
  0xbc   :  { %v590_v15 = vadd.f32 %v589_v5, %v512_v58  ;;  %v195_v18 = vmul.f32 %v963_v2, %v194_v26  ;;  %v163_v60 = vmul.f32 %v162_v29, %v1420_v10  ;;  %v199_v33 = vmul.f32 %v198_v43, %v1420_v10 }
  0xbd   :  { %v558_v53 = vadd.f32 %v557_v55, %v554_v52  ;;  %v1542_v42 = vpop.permute.xlu0 %621  ;;  %v166_v38 = vstv %s1553_s13  ;;  %v202_v45 = vstv %s1555_s15  ;;  %v240_v20 = vstv %s1557_s17  ;;  %s1657_s13 = sld [smem:[#allocation2 + $0x60]]  ;;  %s1659_s15 = sld [smem:[#allocation2 + $0x69]] }
  0xbe   :  { %v594_v4 = vadd.f32 %v593_v35, %v590_v15  ;;  %v639_v17 = vmul.f32 %v638_v14, %v1542_v42  ;;  %v675_v19 = vmul.f32 %v674_v61, %v1542_v42  ;;  %v276_v13 = vstv %s1559_s19 }
  0xbf   :  { %v636_v12 = vadd.f32 %v635_v57, %v558_v53  ;;  %v170_v10 = vstv %s1561_s20  ;;  %v203_v32 = vmul.f32 %v202_v45, %v1316_v34  ;;  %v244_v40 = vstv %s1565_s21  ;;  %s1789_s20 = sld [smem:[#allocation10_spill]]  ;;  %s1670_s21 = sld [smem:[#allocation2 + $0x65]] }
  0xc0   :  { %v672_v0 = vadd.f32 %v671_v6, %v594_v4  ;;  %v280_v58 = vstv %s1567_s23  ;;  %v241_v5 = vmul.f32 %v954_v1, %v240_v20  ;;  %v277_v52 = vmul.f32 %v954_v1, %v276_v13  ;;  %s1674_s23 = sld [smem:[#allocation2 + $0x74]] }
  0xc1   :  { %v640_v48 = vadd.f32 %v639_v17, %v636_v12  ;;  %v245_v53 = vmul.f32 %v244_v40, %v1452_v41  ;;  %v281_v56 = vmul.f32 %v280_v58, %v1452_v41  ;;  %v248_v14 = vstv %s1577_s27  ;;  %s1676_s27 = sld [smem:[#allocation2 + $0x7d]] }
  0xc2   :  { %v676_v51 = vadd.f32 %v675_v19, %v672_v0  ;;  %v284_v1 = vstv %s1579_s28  ;;  %v322_v6 = vstv %s1583_s29  ;;  %v358_v12 = vstv %s1585_s30  ;;  %s1680_s28 = sld [smem:[#allocation2 + $0x5a]]  ;;  %s1682_s29 = sld [smem:[#allocation2 + $0x63]] }
  0xc3   :  { %873 = vst [vmem:[%s1788_s14 + $0x8] sm:$0xff] %v640_v48  ;;  %v252_v17 = vstv %s1589_s4  ;;  %v288_v41 = vstv %s1591_s5  ;;  %v249_v48 = vmul.f32 %v248_v14, %v1320_v21  ;;  %v285_v0 = vmul.f32 %v284_v1, %v1320_v21  ;;  %s1688_s30 = sld [smem:[#allocation2 + $0x72]]  ;;  %s1690_s4 = sld [smem:[#allocation2 + $0x7b]] }
  0xc4   :  { %877 = vst [vmem:[%s1788_s14 + $0x28] sm:$0xff] %v676_v51  ;;  %v362_v49 = vstv %s1601_s18  ;;  %v323_v26 = vmul.f32 %v968_v3, %v322_v6  ;;  %v359_v29 = vmul.f32 %v968_v3, %v358_v12  ;;  %v440_v45 = vstv %s1615_s24  ;;  %s1699_s18 = sld [smem:[#allocation2 + $0x6e]]  ;;  %s1711_s24 = sld [smem:[#allocation2 + $0x6c]] }
  0xc5   :  { %v522_v14 = vstv %s1645_s11  ;;  %v416_v1 = vstv %s1649_s12  ;;  %s1738_s11 = sld [smem:[#allocation2 + $0x7e]]  ;;  %s1740_s12 = sld [smem:[#allocation2 + $0x87]] }
 0x107   :  { %v52_v27 = vpop.permute.xlu1 %51 }
 0x108   :  { %v88_v59 = vmul.f32 %v87_v7, %v52_v27  ;;  %v125_v30 = vmul.f32 %v124_v47, %v52_v27  ;;  %v326_v47 = vstv %s1599_s7 }
 0x10a   :  { %v89_v28 = vadd.f32 %v88_v59, %v1439_v54  ;;  %v126_v11 = vadd.f32 %v125_v30, %v1441_v22  ;;  %v206_v54 = vstv %s1563_s0  ;;  %v167_v22 = vmul.f32 %v166_v38, %v1316_v34  ;;  %s1668_s0 = sld [smem:[#allocation2 + $0x5c]] }
 0x10b   :  { %v136_v44 = vpop.permute.xlu1 %135  ;;  %v363_v59 = vmul.f32 %v362_v49, %v1484_v24  ;;  %v404_v38 = vstv %s1613_s25  ;;  %s1707_s25 = sld [smem:[#allocation2 + $0x8f]] }
 0x10c   :  { %v160_v2 = vadd.f32 %v159_v8, %v89_v28  ;;  %v196_v62 = vadd.f32 %v195_v18, %v126_v11  ;;  %v171_v35 = vmul.f32 %v170_v10, %v136_v44  ;;  %v207_v34 = vmul.f32 %v206_v54, %v136_v44 }
 0x10d   :  { %v327_v18 = vmul.f32 %v326_v47, %v1484_v24  ;;  %v366_v28 = vstv %s1609_s22  ;;  %v370_v24 = vstv %s1621_s26  ;;  %v408_v44 = vstv %s1627_s8  ;;  %s1705_s22 = sld [smem:[#allocation2 + $0x86]]  ;;  %s1719_s26 = sld [smem:[#allocation2 + $0x84]] }
 0x10e   :  { %v164_v39 = vadd.f32 %v163_v60, %v160_v2  ;;  %v200_v37 = vadd.f32 %v199_v33, %v196_v62  ;;  %v330_v33 = vstv %s1607_s1  ;;  %v334_v2 = vstv %s1619_s6  ;;  %s1701_s1 = sld [smem:[#allocation2 + $0x77]]  ;;  %s1713_s6 = sld [smem:[#allocation2 + $0x75]] }
 0x10f   :  { %v218_v19 = vpop.permute.xlu1 %217  ;;  %v331_v20 = vmul.f32 %v330_v33, %v1350_v9  ;;  %v367_v13 = vmul.f32 %v366_v28, %v1350_v9  ;;  %v498_v33 = vstv %s1680_s28  ;;  %s1721_s8 = sld [smem:[#allocation2 + $0x8d]] }
 0x110   :  { %v168_v55 = vadd.f32 %v167_v22, %v164_v39  ;;  %v204_v15 = vadd.f32 %v203_v32, %v200_v37  ;;  %v253_v27 = vmul.f32 %v252_v17, %v218_v19  ;;  %v289_v21 = vmul.f32 %v288_v41, %v218_v19  ;;  %v884_v32 = vld [vmem:[%s1789_s20 + $0x20] sm:$0xff] }
 0x111   :  { %v444_v22 = vstv %s1629_s2  ;;  %v405_v39 = vmul.f32 %v884_v32, %v404_v38  ;;  %v441_v37 = vmul.f32 %v884_v32, %v440_v45  ;;  %v490_v41 = vstv %s1657_s13 }
 0x112   :  { %v172_v4 = vadd.f32 %v171_v35, %v168_v55  ;;  %v208_v57 = vadd.f32 %v207_v34, %v204_v15  ;;  %v445_v55 = vmul.f32 %v444_v22, %v1510_v36  ;;  %v412_v34 = vstv %s1637_s9 }
 0x113   :  { %v300_v62 = vpop.permute.xlu1 %299  ;;  %v526_v19 = vstv %s1659_s15 }
 0x114   :  { %v242_v16 = vadd.f32 %v241_v5, %v172_v4  ;;  %v278_v61 = vadd.f32 %v277_v52, %v208_v57  ;;  %v335_v9 = vmul.f32 %v334_v2, %v300_v62  ;;  %v371_v5 = vmul.f32 %v370_v24, %v300_v62  ;;  %v886_v62 = vld [vmem:[%s1789_s20 + $0x30] sm:$0xff] }
 0x115   :  { %v409_v52 = vmul.f32 %v408_v44, %v1510_v36  ;;  %v486_v57 = vstv %s1643_s10  ;;  %v452_v36 = vstv %s1651_s16  ;;  %v572_v2 = vstv %s1688_s30  ;;  %s1732_s10 = sld [smem:[#allocation2 + $0x89]] }
 0x116   :  { %v246_v51 = vadd.f32 %v245_v53, %v242_v16  ;;  %v282_v7 = vadd.f32 %v281_v56, %v278_v61  ;;  %v448_v53 = vstv %s1639_s3  ;;  %v413_v61 = vmul.f32 %v412_v34, %v1366_v50  ;;  %s1730_s3 = sld [smem:[#allocation2 + $0x80]] }
 0x117   :  { %v382_v16 = vpop.permute.xlu1 %381  ;;  %v449_v6 = vmul.f32 %v448_v53, %v1366_v50  ;;  %v608_v24 = vstv %s1690_s4  ;;  %v573_v22 = vmul.f32 %v572_v2, %v1537_v23 }
 0x118   :  { %v250_v43 = vadd.f32 %v249_v48, %v246_v51  ;;  %v286_v8 = vadd.f32 %v285_v0, %v282_v7  ;;  %v885_v48 = vld [vmem:[%s1789_s20 + $0x28] sm:$0xff]  ;;  %v417_v50 = vmul.f32 %v416_v1, %v382_v16  ;;  %v453_v49 = vmul.f32 %v452_v36, %v382_v16  ;;  %v887_v1 = vld [vmem:[%s1789_s20 + $0x38] sm:$0xff] }
 0x119   :  { %v487_v0 = vmul.f32 %v885_v48, %v486_v57  ;;  %v523_v51 = vmul.f32 %v885_v48, %v522_v14  ;;  %v609_v32 = vmul.f32 %v608_v24, %v1537_v23  ;;  %v654_v57 = vstv %s1719_s26 }
 0x11a   :  { %v254_v30 = vadd.f32 %v253_v27, %v250_v43  ;;  %v290_v60 = vadd.f32 %v289_v21, %v286_v8  ;;  %v494_v8 = vstv %s1668_s0  ;;  %v530_v21 = vstv %s1670_s21 }
 0x11b   :  { %v464_v28 = vpop.permute.xlu1 %463  ;;  %v690_v14 = vstv %s1721_s8 }
 0x11c   :  { %v324_v3 = vadd.f32 %v323_v26, %v254_v30  ;;  %v360_v11 = vadd.f32 %v359_v29, %v290_v60  ;;  %v491_v26 = vmul.f32 %v490_v41, %v1527_v25  ;;  %v527_v29 = vmul.f32 %v526_v19, %v1527_v25 }
 0x11d   :  { %v568_v30 = vstv %s1674_s23  ;;  %v604_v60 = vstv %s1676_s27  ;;  %v534_v25 = vstv %s1682_s29  ;;  %v691_v41 = vmul.f32 %v690_v14, %v1542_v42 }
 0x11e   :  { %v328_v10 = vadd.f32 %v327_v18, %v324_v3  ;;  %v364_v54 = vadd.f32 %v363_v59, %v360_v11  ;;  %v495_v3 = vmul.f32 %v494_v8, %v1392_v46  ;;  %v531_v11 = vmul.f32 %v530_v21, %v1392_v46 }
 0x11f   :  { %v499_v46 = vmul.f32 %v498_v33, %v464_v28  ;;  %v535_v44 = vmul.f32 %v534_v25, %v464_v28  ;;  %v546_v34 = vpop.permute.xlu1 %545 }
 0x120   :  { %v332_v40 = vadd.f32 %v331_v20, %v328_v10  ;;  %v368_v58 = vadd.f32 %v367_v13, %v364_v54  ;;  %v569_v20 = vmul.f32 %v886_v62, %v568_v30  ;;  %v605_v13 = vmul.f32 %v886_v62, %v604_v60 }
 0x122   :  { %v336_v35 = vadd.f32 %v335_v9, %v332_v40  ;;  %v372_v15 = vadd.f32 %v371_v5, %v368_v58  ;;  %v576_v40 = vstv %s1699_s18  ;;  %v612_v9 = vstv %s1701_s1 }
 0x123   :  { %v577_v23 = vmul.f32 %v576_v40, %v1432_v63  ;;  %v613_v53 = vmul.f32 %v612_v9, %v1432_v63  ;;  %v655_v63 = vmul.f32 %v654_v57, %v1542_v42 }
 0x124   :  { %v406_v56 = vadd.f32 %v405_v39, %v336_v35  ;;  %v442_v4 = vadd.f32 %v441_v37, %v372_v15  ;;  %v580_v35 = vstv %s1711_s24  ;;  %v616_v15 = vstv %s1713_s6 }
 0x126   :  { %v410_v12 = vadd.f32 %v409_v52, %v406_v56  ;;  %v446_v17 = vadd.f32 %v445_v55, %v442_v4  ;;  %v650_v52 = vstv %s1705_s22  ;;  %v686_v55 = vstv %s1707_s25 }
 0x127   :  { %v651_v36 = vmul.f32 %v887_v1, %v650_v52  ;;  %v687_v16 = vmul.f32 %v887_v1, %v686_v55 }
 0x128   :  { %v414_v7 = vadd.f32 %v413_v61, %v410_v12  ;;  %v450_v47 = vadd.f32 %v449_v6, %v446_v17  ;;  %v581_v6 = vmul.f32 %v580_v35, %v546_v34  ;;  %v617_v17 = vmul.f32 %v616_v15, %v546_v34 }
 0x12a   :  { %v418_v43 = vadd.f32 %v417_v50, %v414_v7  ;;  %v454_v27 = vadd.f32 %v453_v49, %v450_v47  ;;  %v662_v47 = vstv %s1738_s11  ;;  %v698_v49 = vstv %s1740_s12 }
 0x12c   :  { %v488_v18 = vadd.f32 %v487_v0, %v418_v43  ;;  %v524_v59 = vadd.f32 %v523_v51, %v454_v27  ;;  %v658_v0 = vstv %s1730_s3  ;;  %v694_v51 = vstv %s1732_s10 }
 0x12d   :  { %v695_v43 = vmul.f32 %v694_v51, %v1448_v31 }
 0x12e   :  { %v492_v38 = vadd.f32 %v491_v26, %v488_v18  ;;  %v528_v45 = vadd.f32 %v527_v29, %v524_v59  ;;  %v628_v26 = vpop.permute.xlu1 %627  ;;  %v659_v29 = vmul.f32 %v658_v0, %v1448_v31 }
 0x12f   :  { %v663_v18 = vmul.f32 %v662_v47, %v628_v26  ;;  %v699_v30 = vmul.f32 %v698_v49, %v628_v26 }
 0x130   :  { %v496_v10 = vadd.f32 %v495_v3, %v492_v38  ;;  %v532_v54 = vadd.f32 %v531_v11, %v528_v45 }
 0x132   :  { %v500_v39 = vadd.f32 %v499_v46, %v496_v10  ;;  %v536_v37 = vadd.f32 %v535_v44, %v532_v54 }
 0x134   :  { %v570_v58 = vadd.f32 %v569_v20, %v500_v39  ;;  %v606_v5 = vadd.f32 %v605_v13, %v536_v37 }
 0x136   :  { %v574_v56 = vadd.f32 %v573_v22, %v570_v58  ;;  %v610_v4 = vadd.f32 %v609_v32, %v606_v5 }
 0x138   :  { %v578_v61 = vadd.f32 %v577_v23, %v574_v56  ;;  %v614_v12 = vadd.f32 %v613_v53, %v610_v4 }
 0x13a   :  { %v582_v19 = vadd.f32 %v581_v6, %v578_v61  ;;  %v618_v48 = vadd.f32 %v617_v17, %v614_v12 }
 0x13c   :  { %v652_v7 = vadd.f32 %v651_v36, %v582_v19  ;;  %v688_v50 = vadd.f32 %v687_v16, %v618_v48 }
 0x13e   :  { %v656_v27 = vadd.f32 %v655_v63, %v652_v7  ;;  %v692_v8 = vadd.f32 %v691_v41, %v688_v50 }
 0x140   :  { %v660_v21 = vadd.f32 %v659_v29, %v656_v27  ;;  %v696_v59 = vadd.f32 %v695_v43, %v692_v8 }
 0x142   :  { %v664_v42 = vadd.f32 %v663_v18, %v660_v21  ;;  %v700_v60 = vadd.f32 %v699_v30, %v696_v59 }
 0x144   :  { %875 = vst [vmem:[%s1788_s14 + $0x18] sm:$0xff] %v664_v42  ;;  %879 = vst [vmem:[%s1788_s14 + $0x38] sm:$0xff] %v700_v60 }
 0x145   :  { %720 = vsyncpa [#allocation3], 1 }
 0x146   :  { %721 = vsyncpa [#allocation5], 1 }

</bundles_post_ra>
